<compile_context>
chip_gen: v7x
topology: tpu7x:2x2x1
jax: 0.10.0
libtpu: 0.0.40
codegen_flags: <defaults>
</compile_context>

<pallas_src>
import functools

import jax
import jax.numpy as jnp
from jax import lax
from jax.experimental import pallas as pl
from jax.experimental.pallas import tpu as pltpu


def _round_up(x, m):
    return (x + m - 1) // m * m


def lstm_fused_kernel(x_ref, w_ih_ref, w_hh_ref, b_ref, out_ref, h_sc, c_sc):
    """One (batch shard, time chunk) of the LSTM with fused input projection.

    x_ref:    (TT, BB, Dp)  bf16  time-major inputs for this chunk
    w_ih_ref: (Dp, 4*Hp)    bf16  input weights, gate order (i, f, o, g)
    w_hh_ref: (Hp, 4*Hp)    bf16  recurrent weights, gate order (i, f, o, g)
    b_ref:    (1, 4*Hp)     f32   b_ih + b_hh, gate order (i, f, o, g)
    out_ref:  (TT, BB, Hp)  f32   hidden states (time-major, lane-dense)
    h_sc:     (BB, Hp)      bf16  carried hidden state
    c_sc:     (BB, Hp)      f32   carried cell state
    """
    tc = pl.program_id(1)
    tt, bb, _ = x_ref.shape
    hp = w_hh_ref.shape[0]

    @pl.when(tc == 0)
    def _():
        # nn.LSTM default: zero initial hidden / cell state per batch shard.
        h_sc[...] = jnp.zeros_like(h_sc)
        c_sc[...] = jnp.zeros_like(c_sc)

    # Resident operands, hoisted out of the loop (no per-iteration loads /
    # broadcasts on the critical path).
    w_ih = w_ih_ref[...]
    w_hh = w_hh_ref[...]
    bias = jnp.broadcast_to(b_ref[...], (bb, 4 * hp))

    def step(t, carry):
        # Input projection: independent of the h/c dependency chain, so the
        # scheduler can issue it (and the bias add) ahead of / alongside the
        # neighbouring steps' serial recurrent matmul.
        gx = jnp.dot(x_ref[t], w_ih, preferred_element_type=jnp.float32) + bias

        h_prev = h_sc[...]                       # bf16: feeds the MXU directly
        c_prev = c_sc[...]
        gates = gx + jnp.dot(h_prev, w_hh, preferred_element_type=jnp.float32)

        # Gate order (i, f, o, g): one sigmoid over a contiguous 3*Hp slab,
        # using the exact identity sigmoid(x) = 0.5*tanh(0.5*x) + 0.5
        # (single EUP op + two cheap VPU ops per slab).
        sig = 0.5 * jnp.tanh(0.5 * gates[:, :3 * hp]) + 0.5
        i_g = sig[:, 0 * hp:1 * hp]
        f_g = sig[:, 1 * hp:2 * hp]
        o_g = sig[:, 2 * hp:3 * hp]
        g_g = jnp.tanh(gates[:, 3 * hp:4 * hp])

        c_new = f_g * c_prev + i_g * g_g
        h_new = o_g * jnp.tanh(c_new)

        c_sc[...] = c_new
        h_sc[...] = h_new.astype(h_sc.dtype)
        out_ref[t] = h_new.astype(out_ref.dtype)          # lane-dense store
        return carry

    # Partial unroll so DMA / EUP / input-projection MXU work of neighbouring
    # steps overlaps the serial h @ W_hh chain (full unroll for tiny chunks).
    lax.fori_loop(0, tt, step, 0, unroll=min(tt, 8))


def lstm_forward(x, w_ih, w_hh, b_ih, b_hh, *, matmul_dtype=jnp.bfloat16,
                 batch_chunk=128, max_time_chunk=512):
    """Single-layer, unidirectional, batch_first LSTM. x: (B,T,D) -> (B,T,H)."""
    B, T, D = x.shape
    H = w_ih.shape[0] // 4

    Hp = _round_up(H, 128)                         # lane padding
    Dp = _round_up(D, 128)
    # 16-row batch tiles keep bf16 sublane packing trivially aligned.
    sub = 16 if jnp.dtype(matmul_dtype).itemsize < 4 else 8
    BB = _round_up(min(batch_chunk, _round_up(B, sub)), sub)
    Bp = _round_up(_round_up(B, sub), BB)

    # ---- per-generation VMEM budget -> time-chunk size ----------------------
    try:
        info = pltpu.get_tpu_info()
        vmem_cap = int(getattr(info, "vmem_capacity_bytes", 64 * 1024 * 1024))
    except Exception:                              # pragma: no cover
        vmem_cap = 64 * 1024 * 1024                # conservative (v7x) fallback

    bpe_mm = jnp.dtype(matmul_dtype).itemsize      # 2 (bf16 operands)
    bpe_out = jnp.dtype(x.dtype).itemsize          # 4 (f32 output)
    w_bytes = (Dp + Hp) * 4 * Hp * bpe_mm          # W_ih + W_hh, one copy
    fixed_bytes = (
        2 * w_bytes                                # pipeline buffers (see TODO)
        + w_bytes                                  # hoisted in-kernel values
        + (2 + BB) * 4 * Hp * 4                    # bias blocks + broadcast
        + BB * Hp * (bpe_mm + 4)                   # h (bf16) + c (f32) state
        + 8 * BB * 4 * Hp * 4)                     # unrolled-step temporaries
    per_tb_bytes = 2 * Dp * bpe_mm + 2 * Hp * bpe_out   # x + out, double-buf

    budget = max(vmem_cap - 8 * 1024 * 1024, 16 * 1024 * 1024)
    tt_cap = max((budget - fixed_bytes) // (per_tb_bytes * BB), 8)
    TT = int(max(8, min(_round_up(T, 8), (tt_cap // 8) * 8, max_time_chunk)))
    Tp = _round_up(T, TT)

    vmem_need = fixed_bytes + per_tb_bytes * BB * TT
    vmem_limit = int(min(max(vmem_need + 4 * 1024 * 1024, 32 * 1024 * 1024),
                         vmem_cap))

    # ---- weights / bias: gate-reordered to (i, f, o, g), padded, bf16 -------
    perm = jnp.array([0, 1, 3, 2], dtype=jnp.int32)   # (i,f,g,o) -> (i,f,o,g)
    w_ih_g = w_ih.reshape(4, H, D)[perm]
    w_hh_g = w_hh.reshape(4, H, H)[perm]
    bias_g = (b_ih + b_hh).reshape(4, H)[perm]

    w_ih_k = jnp.transpose(w_ih_g, (2, 0, 1))         # (D, 4, H)
    w_ih_k = jnp.pad(w_ih_k, ((0, Dp - D), (0, 0), (0, Hp - H)))
    w_ih_k = w_ih_k.reshape(Dp, 4 * Hp).astype(matmul_dtype)

    w_hh_k = jnp.transpose(w_hh_g, (2, 0, 1))         # (H, 4, H)
    w_hh_k = jnp.pad(w_hh_k, ((0, Hp - H), (0, 0), (0, Hp - H)))
    w_hh_k = w_hh_k.reshape(Hp, 4 * Hp).astype(matmul_dtype)

    bias_k = jnp.pad(bias_g, ((0, 0), (0, Hp - H)))
    bias_k = bias_k.reshape(1, 4 * Hp).astype(jnp.float32)

    # ---- x: time-major, padded, bf16 (one small fused XLA pass) -------------
    x_tm = jnp.transpose(x, (1, 0, 2)).astype(matmul_dtype)
    x_tm = jnp.pad(x_tm, ((0, Tp - T), (0, Bp - B), (0, Dp - D)))

    grid = (Bp // BB, Tp // TT)

    out_tm = pl.pallas_call(
        lstm_fused_kernel,
        out_shape=jax.ShapeDtypeStruct((Tp, Bp, Hp), x.dtype),
        grid_spec=pltpu.PrefetchScalarGridSpec(
            num_scalar_prefetch=0,
            grid=grid,
            in_specs=[
                pl.BlockSpec((TT, BB, Dp), lambda b, t: (t, b, 0)),   # x
                pl.BlockSpec((Dp, 4 * Hp), lambda b, t: (0, 0)),      # W_ih
                pl.BlockSpec((Hp, 4 * Hp), lambda b, t: (0, 0)),      # W_hh
                pl.BlockSpec((1, 4 * Hp), lambda b, t: (0, 0)),       # bias
            ],
            out_specs=pl.BlockSpec((TT, BB, Hp), lambda b, t: (t, b, 0)),
            scratch_shapes=[
                pltpu.VMEM((BB, Hp), matmul_dtype),   # h state (bf16)
                pltpu.VMEM((BB, Hp), jnp.float32),    # c state (f32)
            ],
        ),
        compiler_params=pltpu.CompilerParams(
            # Batch shards are independent (megacore-splittable); the time
            # axis is a serial recurrence.
            dimension_semantics=("parallel", "arbitrary"),
            vmem_limit_bytes=vmem_limit),
    )(x_tm, w_ih_k, w_hh_k, bias_k)

    # TODO(synk): emit batch-first directly from the kernel to remove this
    # extra HBM read+write (kept as one fused XLA slice+transpose for safety).
    return jnp.transpose(out_tm[:T, :B, :H], (1, 0, 2))


def size_tracking_lstm_forward(x, sizes, params, h_out):
    """Mirrors SizeTrackingLSTM.forward: (out, cat(seq_lens, h_out))."""
    out = lstm_forward(x, *params)
    # _calculate_sizes: trivial integer bookkeeping, kept as JAX glue.
    batch_size = sizes.shape[0]
    seq_lens = sizes[:, 0].reshape(batch_size, 1)
    h_out_col = jnp.ones((batch_size, 1), dtype=sizes.dtype) * h_out
    sizes_out = jnp.concatenate([seq_lens, h_out_col], axis=1)
    return out, sizes_out


def lstm_reference(x, w_ih, w_hh, b_ih, b_hh):
    """Pure-JAX f32 reference (PyTorch gate order i, f, g, o)."""
    B, _, _ = x.shape
    H = w_ih.shape[0] // 4

    def step(carry, x_t):
        h, c = carry
        gates = x_t @ w_ih.T + h @ w_hh.T + b_ih + b_hh
        i, f, g, o = jnp.split(gates, 4, axis=-1)
        i = jax.nn.sigmoid(i)
        f = jax.nn.sigmoid(f)
        g = jnp.tanh(g)
        o = jax.nn.sigmoid(o)
        c = f * c + i * g
        h = o * jnp.tanh(c)
        return (h, c), h

    h0 = jnp.zeros((B, H), jnp.float32)
    (_, _), hs = lax.scan(step, (h0, h0), jnp.transpose(x, (1, 0, 2)))
    return jnp.transpose(hs, (1, 0, 2))


def init_lstm_params(key, input_size, hidden_size):
    """Deterministic init matching nn.LSTM shapes: U(-1/sqrt(H), 1/sqrt(H))."""
    k = 1.0 / jnp.sqrt(jnp.float32(hidden_size))
    k_ih, k_hh, k_bi, k_bh = jax.random.split(key, 4)
    w_ih = jax.random.uniform(k_ih, (4 * hidden_size, input_size),
                              jnp.float32, -k, k)
    w_hh = jax.random.uniform(k_hh, (4 * hidden_size, hidden_size),
                              jnp.float32, -k, k)
    b_ih = jax.random.uniform(k_bi, (4 * hidden_size,), jnp.float32, -k, k)
    b_hh = jax.random.uniform(k_bh, (4 * hidden_size,), jnp.float32, -k, k)
    return w_ih, w_hh, b_ih, b_hh


if __name__ == "__main__":
    # Small shapes consistent with the module: nn.LSTM(input_size=16,
    # hidden_size=32, batch_first=True), batch=2, seq=8.
    B, T, D, H = 2, 8, 16, 32
    h_out = H  # proj_size == 0, unidirectional

    key = jax.random.PRNGKey(0)
    k_x, k_p = jax.random.split(key)
    x = jax.random.normal(k_x, (B, T, D), dtype=jnp.float32)
    # sizes: (batch, 2) int32 tensor whose first column is the sequence length.
    sizes = jnp.array([[T, 0], [T - 3, 0]], dtype=jnp.int32)

    params = init_lstm_params(k_p, D, H)

    fwd = jax.jit(functools.partial(size_tracking_lstm_forward,
                                    params=params, h_out=h_out))
    out, sizes_out = fwd(x, sizes)
    jax.block_until_ready((out, sizes_out))

    assert out.shape == (B, T, H) and out.dtype == jnp.float32
    assert sizes_out.shape == (B, 2) and sizes_out.dtype == jnp.int32
    assert bool(jnp.all(jnp.isfinite(out)))
    assert bool(jnp.all(sizes_out[:, 1] == h_out))

    # Tolerance check vs. an f32 reference (bf16 matmul operands + bf16
    # carried h introduce small rounding; structural bugs would be O(0.3+)).
    ref = lstm_reference(x, *params)
    err = float(jnp.max(jnp.abs(out - ref)))
    assert err < 1e-1, f"max abs error vs f32 reference: {err}"

    print("KERNEL_OK")
</pallas_src>

<mosaic_0001>
module attributes {stable_mosaic.version = 11 : i64} {
  func.func @lstm_fused_kernel(%arg0: i32, %arg1: i32, %arg2: memref<8x16x128xbf16, #tpu.memory_space<vmem>>, %arg3: memref<128x512xbf16, #tpu.memory_space<vmem>>, %arg4: memref<128x512xbf16, #tpu.memory_space<vmem>>, %arg5: memref<1x512xf32, #tpu.memory_space<vmem>>, %arg6: memref<8x16x128xf32, #tpu.memory_space<vmem>>, %arg7: memref<16x128xbf16, #tpu.memory_space<vmem>>, %arg8: memref<16x128xf32, #tpu.memory_space<vmem>>) attributes {dimension_semantics = [#tpu.dimension_semantics<parallel>, #tpu.dimension_semantics<arbitrary>], iteration_bounds = array<i64: 1, 1>, scalar_prefetch = 0 : i64, scratch_operands = 2 : i64, tpu.core_type = #tpu.core_type<tc>, window_params = [{transform_indices = @transform_0, window_bounds = array<i64: 8, 16, 128>}, {pipeline_mode = #tpu.pipeline_mode<synchronous>, transform_indices = @transform_1, window_bounds = array<i64: 128, 512>}, {pipeline_mode = #tpu.pipeline_mode<synchronous>, transform_indices = @transform_2, window_bounds = array<i64: 128, 512>}, {pipeline_mode = #tpu.pipeline_mode<synchronous>, transform_indices = @transform_3, window_bounds = array<i64: 1, 512>}, {transform_indices = @transform_4, window_bounds = array<i64: 8, 16, 128>}]} {
    %c0_i32 = arith.constant 0 : i32
    %0 = arith.cmpi eq, %arg1, %c0_i32 : i32
    %1 = arith.extui %0 : i1 to i32
    %c0_i32_0 = arith.constant 0 : i32
    %2 = arith.cmpi ne, %1, %c0_i32_0 : i32
    scf.if %2 {
      %cst_142 = arith.constant 0.000000e+00 : bf16
      %280 = vector.broadcast %cst_142 : bf16 to vector<16x128xbf16>
      %c0_143 = arith.constant 0 : index
      %c0_144 = arith.constant 0 : index
      %281 = vector.load %arg7[%c0_143, %c0_144] : memref<16x128xbf16, #tpu.memory_space<vmem>>, vector<16x128xbf16>
      tpu.vector_store %arg7[%c0_143, %c0_144], %280 {strides = array<i32>} : memref<16x128xbf16, #tpu.memory_space<vmem>>, vector<16x128xbf16>,
      %cst_145 = arith.constant 0.000000e+00 : f32
      %282 = vector.broadcast %cst_145 : f32 to vector<16x128xf32>
      %c0_146 = arith.constant 0 : index
      %c0_147 = arith.constant 0 : index
      %283 = vector.load %arg8[%c0_146, %c0_147] : memref<16x128xf32, #tpu.memory_space<vmem>>, vector<16x128xf32>
      tpu.vector_store %arg8[%c0_146, %c0_147], %282 {strides = array<i32>} : memref<16x128xf32, #tpu.memory_space<vmem>>, vector<16x128xf32>,
    } else {
    }
    %c0 = arith.constant 0 : index
    %c0_1 = arith.constant 0 : index
    %3 = vector.load %arg3[%c0, %c0_1] : memref<128x512xbf16, #tpu.memory_space<vmem>>, vector<128x512xbf16>
    %c0_2 = arith.constant 0 : index
    %c0_3 = arith.constant 0 : index
    %4 = vector.load %arg4[%c0_2, %c0_3] : memref<128x512xbf16, #tpu.memory_space<vmem>>, vector<128x512xbf16>
    %c0_4 = arith.constant 0 : index
    %c0_5 = arith.constant 0 : index
    %5 = vector.load %arg5[%c0_4, %c0_5] : memref<1x512xf32, #tpu.memory_space<vmem>>, vector<1x512xf32>
    %6 = vector.shape_cast %5 : vector<1x512xf32> to vector<1x512xf32>
    %7 = vector.broadcast %6 : vector<1x512xf32> to vector<16x512xf32>
    %c0_i32_6 = arith.constant 0 : i32
    %8 = arith.index_cast %c0_i32_6 : i32 to index
    %c0_7 = arith.constant 0 : index
    %c0_8 = arith.constant 0 : index
    %9 = vector.load %arg2[%8, %c0_7, %c0_8] : memref<8x16x128xbf16, #tpu.memory_space<vmem>>, vector<1x16x128xbf16>
    %10 = vector.shape_cast %9 : vector<1x16x128xbf16> to vector<16x128xbf16>
    %cst = arith.constant dense<0.000000e+00> : vector<16x512xf32>
    %11 = tpu.matmul %10, %3, %cst {dimension_numbers = #tpu.dot_dimension_numbers<[1], [0], [0], [1], [0, 0, 1, 1], [], []>} : vector<16x128xbf16>, vector<128x512xbf16>, vector<16x512xf32> -> vector<16x512xf32>
    %12 = arith.addf %11, %7 : vector<16x512xf32>
    %c0_9 = arith.constant 0 : index
    %c0_10 = arith.constant 0 : index
    %13 = vector.load %arg7[%c0_9, %c0_10] : memref<16x128xbf16, #tpu.memory_space<vmem>>, vector<16x128xbf16>
    %c0_11 = arith.constant 0 : index
    %c0_12 = arith.constant 0 : index
    %14 = vector.load %arg8[%c0_11, %c0_12] : memref<16x128xf32, #tpu.memory_space<vmem>>, vector<16x128xf32>
    %cst_13 = arith.constant dense<0.000000e+00> : vector<16x512xf32>
    %15 = tpu.matmul %13, %4, %cst_13 {dimension_numbers = #tpu.dot_dimension_numbers<[1], [0], [0], [1], [0, 0, 1, 1], [], []>} : vector<16x128xbf16>, vector<128x512xbf16>, vector<16x512xf32> -> vector<16x512xf32>
    %16 = arith.addf %12, %15 : vector<16x512xf32>
    %17 = vector.extract_strided_slice %16 {offsets = [0, 0], sizes = [16, 384], strides = [1, 1]} : vector<16x512xf32> to vector<16x384xf32>
    %cst_14 = arith.constant 5.000000e-01 : f32
    %18 = vector.broadcast %cst_14 : f32 to vector<16x384xf32>
    %19 = arith.mulf %18, %17 : vector<16x384xf32>
    %20 = math.tanh %19 : vector<16x384xf32>
    %cst_15 = arith.constant 5.000000e-01 : f32
    %21 = vector.broadcast %cst_15 : f32 to vector<16x384xf32>
    %22 = arith.mulf %21, %20 : vector<16x384xf32>
    %cst_16 = arith.constant 5.000000e-01 : f32
    %23 = vector.broadcast %cst_16 : f32 to vector<16x384xf32>
    %24 = arith.addf %22, %23 : vector<16x384xf32>
    %25 = vector.extract_strided_slice %24 {offsets = [0, 0], sizes = [16, 128], strides = [1, 1]} : vector<16x384xf32> to vector<16x128xf32>
    %26 = vector.extract_strided_slice %24 {offsets = [0, 128], sizes = [16, 128], strides = [1, 1]} : vector<16x384xf32> to vector<16x128xf32>
    %27 = vector.extract_strided_slice %24 {offsets = [0, 256], sizes = [16, 128], strides = [1, 1]} : vector<16x384xf32> to vector<16x128xf32>
    %28 = vector.extract_strided_slice %16 {offsets = [0, 384], sizes = [16, 128], strides = [1, 1]} : vector<16x512xf32> to vector<16x128xf32>
    %29 = math.tanh %28 : vector<16x128xf32>
    %30 = arith.mulf %26, %14 : vector<16x128xf32>
    %31 = arith.mulf %25, %29 : vector<16x128xf32>
    %32 = arith.addf %30, %31 : vector<16x128xf32>
    %33 = math.tanh %32 : vector<16x128xf32>
    %34 = arith.mulf %27, %33 : vector<16x128xf32>
    %c0_17 = arith.constant 0 : index
    %c0_18 = arith.constant 0 : index
    %35 = vector.load %arg8[%c0_17, %c0_18] : memref<16x128xf32, #tpu.memory_space<vmem>>, vector<16x128xf32>
    tpu.vector_store %arg8[%c0_17, %c0_18], %32 {strides = array<i32>} : memref<16x128xf32, #tpu.memory_space<vmem>>, vector<16x128xf32>,
    %36 = arith.truncf %34 : vector<16x128xf32> to vector<16x128xbf16>
    %c0_19 = arith.constant 0 : index
    %c0_20 = arith.constant 0 : index
    %37 = vector.load %arg7[%c0_19, %c0_20] : memref<16x128xbf16, #tpu.memory_space<vmem>>, vector<16x128xbf16>
    tpu.vector_store %arg7[%c0_19, %c0_20], %36 {strides = array<i32>} : memref<16x128xbf16, #tpu.memory_space<vmem>>, vector<16x128xbf16>,
    %38 = arith.index_cast %c0_i32_6 : i32 to index
    %c0_21 = arith.constant 0 : index
    %c0_22 = arith.constant 0 : index
    %39 = vector.load %arg6[%38, %c0_21, %c0_22] : memref<8x16x128xf32, #tpu.memory_space<vmem>>, vector<1x16x128xf32>
    %40 = vector.shape_cast %39 : vector<1x16x128xf32> to vector<16x128xf32>
    %41 = vector.shape_cast %34 : vector<16x128xf32> to vector<1x16x128xf32>
    tpu.vector_store %arg6[%38, %c0_21, %c0_22], %41 {strides = array<i32>} : memref<8x16x128xf32, #tpu.memory_space<vmem>>, vector<1x16x128xf32>,
    %c1_i32 = arith.constant 1 : i32
    %42 = arith.index_cast %c1_i32 : i32 to index
    %c0_23 = arith.constant 0 : index
    %c0_24 = arith.constant 0 : index
    %43 = vector.load %arg2[%42, %c0_23, %c0_24] : memref<8x16x128xbf16, #tpu.memory_space<vmem>>, vector<1x16x128xbf16>
    %44 = vector.shape_cast %43 : vector<1x16x128xbf16> to vector<16x128xbf16>
    %cst_25 = arith.constant dense<0.000000e+00> : vector<16x512xf32>
    %45 = tpu.matmul %44, %3, %cst_25 {dimension_numbers = #tpu.dot_dimension_numbers<[1], [0], [0], [1], [0, 0, 1, 1], [], []>} : vector<16x128xbf16>, vector<128x512xbf16>, vector<16x512xf32> -> vector<16x512xf32>
    %46 = arith.addf %45, %7 : vector<16x512xf32>
    %c0_26 = arith.constant 0 : index
    %c0_27 = arith.constant 0 : index
    %47 = vector.load %arg7[%c0_26, %c0_27] : memref<16x128xbf16, #tpu.memory_space<vmem>>, vector<16x128xbf16>
    %c0_28 = arith.constant 0 : index
    %c0_29 = arith.constant 0 : index
    %48 = vector.load %arg8[%c0_28, %c0_29] : memref<16x128xf32, #tpu.memory_space<vmem>>, vector<16x128xf32>
    %cst_30 = arith.constant dense<0.000000e+00> : vector<16x512xf32>
    %49 = tpu.matmul %47, %4, %cst_30 {dimension_numbers = #tpu.dot_dimension_numbers<[1], [0], [0], [1], [0, 0, 1, 1], [], []>} : vector<16x128xbf16>, vector<128x512xbf16>, vector<16x512xf32> -> vector<16x512xf32>
    %50 = arith.addf %46, %49 : vector<16x512xf32>
    %51 = vector.extract_strided_slice %50 {offsets = [0, 0], sizes = [16, 384], strides = [1, 1]} : vector<16x512xf32> to vector<16x384xf32>
    %cst_31 = arith.constant 5.000000e-01 : f32
    %52 = vector.broadcast %cst_31 : f32 to vector<16x384xf32>
    %53 = arith.mulf %52, %51 : vector<16x384xf32>
    %54 = math.tanh %53 : vector<16x384xf32>
    %cst_32 = arith.constant 5.000000e-01 : f32
    %55 = vector.broadcast %cst_32 : f32 to vector<16x384xf32>
    %56 = arith.mulf %55, %54 : vector<16x384xf32>
    %cst_33 = arith.constant 5.000000e-01 : f32
    %57 = vector.broadcast %cst_33 : f32 to vector<16x384xf32>
    %58 = arith.addf %56, %57 : vector<16x384xf32>
    %59 = vector.extract_strided_slice %58 {offsets = [0, 0], sizes = [16, 128], strides = [1, 1]} : vector<16x384xf32> to vector<16x128xf32>
    %60 = vector.extract_strided_slice %58 {offsets = [0, 128], sizes = [16, 128], strides = [1, 1]} : vector<16x384xf32> to vector<16x128xf32>
    %61 = vector.extract_strided_slice %58 {offsets = [0, 256], sizes = [16, 128], strides = [1, 1]} : vector<16x384xf32> to vector<16x128xf32>
    %62 = vector.extract_strided_slice %50 {offsets = [0, 384], sizes = [16, 128], strides = [1, 1]} : vector<16x512xf32> to vector<16x128xf32>
    %63 = math.tanh %62 : vector<16x128xf32>
    %64 = arith.mulf %60, %48 : vector<16x128xf32>
    %65 = arith.mulf %59, %63 : vector<16x128xf32>
    %66 = arith.addf %64, %65 : vector<16x128xf32>
    %67 = math.tanh %66 : vector<16x128xf32>
    %68 = arith.mulf %61, %67 : vector<16x128xf32>
    %c0_34 = arith.constant 0 : index
    %c0_35 = arith.constant 0 : index
    %69 = vector.load %arg8[%c0_34, %c0_35] : memref<16x128xf32, #tpu.memory_space<vmem>>, vector<16x128xf32>
    tpu.vector_store %arg8[%c0_34, %c0_35], %66 {strides = array<i32>} : memref<16x128xf32, #tpu.memory_space<vmem>>, vector<16x128xf32>,
    %70 = arith.truncf %68 : vector<16x128xf32> to vector<16x128xbf16>
    %c0_36 = arith.constant 0 : index
    %c0_37 = arith.constant 0 : index
    %71 = vector.load %arg7[%c0_36, %c0_37] : memref<16x128xbf16, #tpu.memory_space<vmem>>, vector<16x128xbf16>
    tpu.vector_store %arg7[%c0_36, %c0_37], %70 {strides = array<i32>} : memref<16x128xbf16, #tpu.memory_space<vmem>>, vector<16x128xbf16>,
    %72 = arith.index_cast %c1_i32 : i32 to index
    %c0_38 = arith.constant 0 : index
    %c0_39 = arith.constant 0 : index
    %73 = vector.load %arg6[%72, %c0_38, %c0_39] : memref<8x16x128xf32, #tpu.memory_space<vmem>>, vector<1x16x128xf32>
    %74 = vector.shape_cast %73 : vector<1x16x128xf32> to vector<16x128xf32>
    %75 = vector.shape_cast %68 : vector<16x128xf32> to vector<1x16x128xf32>
    tpu.vector_store %arg6[%72, %c0_38, %c0_39], %75 {strides = array<i32>} : memref<8x16x128xf32, #tpu.memory_space<vmem>>, vector<1x16x128xf32>,
    %c2_i32 = arith.constant 2 : i32
    %76 = arith.index_cast %c2_i32 : i32 to index
    %c0_40 = arith.constant 0 : index
    %c0_41 = arith.constant 0 : index
    %77 = vector.load %arg2[%76, %c0_40, %c0_41] : memref<8x16x128xbf16, #tpu.memory_space<vmem>>, vector<1x16x128xbf16>
    %78 = vector.shape_cast %77 : vector<1x16x128xbf16> to vector<16x128xbf16>
    %cst_42 = arith.constant dense<0.000000e+00> : vector<16x512xf32>
    %79 = tpu.matmul %78, %3, %cst_42 {dimension_numbers = #tpu.dot_dimension_numbers<[1], [0], [0], [1], [0, 0, 1, 1], [], []>} : vector<16x128xbf16>, vector<128x512xbf16>, vector<16x512xf32> -> vector<16x512xf32>
    %80 = arith.addf %79, %7 : vector<16x512xf32>
    %c0_43 = arith.constant 0 : index
    %c0_44 = arith.constant 0 : index
    %81 = vector.load %arg7[%c0_43, %c0_44] : memref<16x128xbf16, #tpu.memory_space<vmem>>, vector<16x128xbf16>
    %c0_45 = arith.constant 0 : index
    %c0_46 = arith.constant 0 : index
    %82 = vector.load %arg8[%c0_45, %c0_46] : memref<16x128xf32, #tpu.memory_space<vmem>>, vector<16x128xf32>
    %cst_47 = arith.constant dense<0.000000e+00> : vector<16x512xf32>
    %83 = tpu.matmul %81, %4, %cst_47 {dimension_numbers = #tpu.dot_dimension_numbers<[1], [0], [0], [1], [0, 0, 1, 1], [], []>} : vector<16x128xbf16>, vector<128x512xbf16>, vector<16x512xf32> -> vector<16x512xf32>
    %84 = arith.addf %80, %83 : vector<16x512xf32>
    %85 = vector.extract_strided_slice %84 {offsets = [0, 0], sizes = [16, 384], strides = [1, 1]} : vector<16x512xf32> to vector<16x384xf32>
    %cst_48 = arith.constant 5.000000e-01 : f32
    %86 = vector.broadcast %cst_48 : f32 to vector<16x384xf32>
    %87 = arith.mulf %86, %85 : vector<16x384xf32>
    %88 = math.tanh %87 : vector<16x384xf32>
    %cst_49 = arith.constant 5.000000e-01 : f32
    %89 = vector.broadcast %cst_49 : f32 to vector<16x384xf32>
    %90 = arith.mulf %89, %88 : vector<16x384xf32>
    %cst_50 = arith.constant 5.000000e-01 : f32
    %91 = vector.broadcast %cst_50 : f32 to vector<16x384xf32>
    %92 = arith.addf %90, %91 : vector<16x384xf32>
    %93 = vector.extract_strided_slice %92 {offsets = [0, 0], sizes = [16, 128], strides = [1, 1]} : vector<16x384xf32> to vector<16x128xf32>
    %94 = vector.extract_strided_slice %92 {offsets = [0, 128], sizes = [16, 128], strides = [1, 1]} : vector<16x384xf32> to vector<16x128xf32>
    %95 = vector.extract_strided_slice %92 {offsets = [0, 256], sizes = [16, 128], strides = [1, 1]} : vector<16x384xf32> to vector<16x128xf32>
    %96 = vector.extract_strided_slice %84 {offsets = [0, 384], sizes = [16, 128], strides = [1, 1]} : vector<16x512xf32> to vector<16x128xf32>
    %97 = math.tanh %96 : vector<16x128xf32>
    %98 = arith.mulf %94, %82 : vector<16x128xf32>
    %99 = arith.mulf %93, %97 : vector<16x128xf32>
    %100 = arith.addf %98, %99 : vector<16x128xf32>
    %101 = math.tanh %100 : vector<16x128xf32>
    %102 = arith.mulf %95, %101 : vector<16x128xf32>
    %c0_51 = arith.constant 0 : index
    %c0_52 = arith.constant 0 : index
    %103 = vector.load %arg8[%c0_51, %c0_52] : memref<16x128xf32, #tpu.memory_space<vmem>>, vector<16x128xf32>
    tpu.vector_store %arg8[%c0_51, %c0_52], %100 {strides = array<i32>} : memref<16x128xf32, #tpu.memory_space<vmem>>, vector<16x128xf32>,
    %104 = arith.truncf %102 : vector<16x128xf32> to vector<16x128xbf16>
    %c0_53 = arith.constant 0 : index
    %c0_54 = arith.constant 0 : index
    %105 = vector.load %arg7[%c0_53, %c0_54] : memref<16x128xbf16, #tpu.memory_space<vmem>>, vector<16x128xbf16>
    tpu.vector_store %arg7[%c0_53, %c0_54], %104 {strides = array<i32>} : memref<16x128xbf16, #tpu.memory_space<vmem>>, vector<16x128xbf16>,
    %106 = arith.index_cast %c2_i32 : i32 to index
    %c0_55 = arith.constant 0 : index
    %c0_56 = arith.constant 0 : index
    %107 = vector.load %arg6[%106, %c0_55, %c0_56] : memref<8x16x128xf32, #tpu.memory_space<vmem>>, vector<1x16x128xf32>
    %108 = vector.shape_cast %107 : vector<1x16x128xf32> to vector<16x128xf32>
    %109 = vector.shape_cast %102 : vector<16x128xf32> to vector<1x16x128xf32>
    tpu.vector_store %arg6[%106, %c0_55, %c0_56], %109 {strides = array<i32>} : memref<8x16x128xf32, #tpu.memory_space<vmem>>, vector<1x16x128xf32>,
    %c3_i32 = arith.constant 3 : i32
    %110 = arith.index_cast %c3_i32 : i32 to index
    %c0_57 = arith.constant 0 : index
    %c0_58 = arith.constant 0 : index
    %111 = vector.load %arg2[%110, %c0_57, %c0_58] : memref<8x16x128xbf16, #tpu.memory_space<vmem>>, vector<1x16x128xbf16>
    %112 = vector.shape_cast %111 : vector<1x16x128xbf16> to vector<16x128xbf16>
    %cst_59 = arith.constant dense<0.000000e+00> : vector<16x512xf32>
    %113 = tpu.matmul %112, %3, %cst_59 {dimension_numbers = #tpu.dot_dimension_numbers<[1], [0], [0], [1], [0, 0, 1, 1], [], []>} : vector<16x128xbf16>, vector<128x512xbf16>, vector<16x512xf32> -> vector<16x512xf32>
    %114 = arith.addf %113, %7 : vector<16x512xf32>
    %c0_60 = arith.constant 0 : index
    %c0_61 = arith.constant 0 : index
    %115 = vector.load %arg7[%c0_60, %c0_61] : memref<16x128xbf16, #tpu.memory_space<vmem>>, vector<16x128xbf16>
    %c0_62 = arith.constant 0 : index
    %c0_63 = arith.constant 0 : index
    %116 = vector.load %arg8[%c0_62, %c0_63] : memref<16x128xf32, #tpu.memory_space<vmem>>, vector<16x128xf32>
    %cst_64 = arith.constant dense<0.000000e+00> : vector<16x512xf32>
    %117 = tpu.matmul %115, %4, %cst_64 {dimension_numbers = #tpu.dot_dimension_numbers<[1], [0], [0], [1], [0, 0, 1, 1], [], []>} : vector<16x128xbf16>, vector<128x512xbf16>, vector<16x512xf32> -> vector<16x512xf32>
    %118 = arith.addf %114, %117 : vector<16x512xf32>
    %119 = vector.extract_strided_slice %118 {offsets = [0, 0], sizes = [16, 384], strides = [1, 1]} : vector<16x512xf32> to vector<16x384xf32>
    %cst_65 = arith.constant 5.000000e-01 : f32
    %120 = vector.broadcast %cst_65 : f32 to vector<16x384xf32>
    %121 = arith.mulf %120, %119 : vector<16x384xf32>
    %122 = math.tanh %121 : vector<16x384xf32>
    %cst_66 = arith.constant 5.000000e-01 : f32
    %123 = vector.broadcast %cst_66 : f32 to vector<16x384xf32>
    %124 = arith.mulf %123, %122 : vector<16x384xf32>
    %cst_67 = arith.constant 5.000000e-01 : f32
    %125 = vector.broadcast %cst_67 : f32 to vector<16x384xf32>
    %126 = arith.addf %124, %125 : vector<16x384xf32>
    %127 = vector.extract_strided_slice %126 {offsets = [0, 0], sizes = [16, 128], strides = [1, 1]} : vector<16x384xf32> to vector<16x128xf32>
    %128 = vector.extract_strided_slice %126 {offsets = [0, 128], sizes = [16, 128], strides = [1, 1]} : vector<16x384xf32> to vector<16x128xf32>
    %129 = vector.extract_strided_slice %126 {offsets = [0, 256], sizes = [16, 128], strides = [1, 1]} : vector<16x384xf32> to vector<16x128xf32>
    %130 = vector.extract_strided_slice %118 {offsets = [0, 384], sizes = [16, 128], strides = [1, 1]} : vector<16x512xf32> to vector<16x128xf32>
    %131 = math.tanh %130 : vector<16x128xf32>
    %132 = arith.mulf %128, %116 : vector<16x128xf32>
    %133 = arith.mulf %127, %131 : vector<16x128xf32>
    %134 = arith.addf %132, %133 : vector<16x128xf32>
    %135 = math.tanh %134 : vector<16x128xf32>
    %136 = arith.mulf %129, %135 : vector<16x128xf32>
    %c0_68 = arith.constant 0 : index
    %c0_69 = arith.constant 0 : index
    %137 = vector.load %arg8[%c0_68, %c0_69] : memref<16x128xf32, #tpu.memory_space<vmem>>, vector<16x128xf32>
    tpu.vector_store %arg8[%c0_68, %c0_69], %134 {strides = array<i32>} : memref<16x128xf32, #tpu.memory_space<vmem>>, vector<16x128xf32>,
    %138 = arith.truncf %136 : vector<16x128xf32> to vector<16x128xbf16>
    %c0_70 = arith.constant 0 : index
    %c0_71 = arith.constant 0 : index
    %139 = vector.load %arg7[%c0_70, %c0_71] : memref<16x128xbf16, #tpu.memory_space<vmem>>, vector<16x128xbf16>
    tpu.vector_store %arg7[%c0_70, %c0_71], %138 {strides = array<i32>} : memref<16x128xbf16, #tpu.memory_space<vmem>>, vector<16x128xbf16>,
    %140 = arith.index_cast %c3_i32 : i32 to index
    %c0_72 = arith.constant 0 : index
    %c0_73 = arith.constant 0 : index
    %141 = vector.load %arg6[%140, %c0_72, %c0_73] : memref<8x16x128xf32, #tpu.memory_space<vmem>>, vector<1x16x128xf32>
    %142 = vector.shape_cast %141 : vector<1x16x128xf32> to vector<16x128xf32>
    %143 = vector.shape_cast %136 : vector<16x128xf32> to vector<1x16x128xf32>
    tpu.vector_store %arg6[%140, %c0_72, %c0_73], %143 {strides = array<i32>} : memref<8x16x128xf32, #tpu.memory_space<vmem>>, vector<1x16x128xf32>,
    %c4_i32 = arith.constant 4 : i32
    %144 = arith.index_cast %c4_i32 : i32 to index
    %c0_74 = arith.constant 0 : index
    %c0_75 = arith.constant 0 : index
    %145 = vector.load %arg2[%144, %c0_74, %c0_75] : memref<8x16x128xbf16, #tpu.memory_space<vmem>>, vector<1x16x128xbf16>
    %146 = vector.shape_cast %145 : vector<1x16x128xbf16> to vector<16x128xbf16>
    %cst_76 = arith.constant dense<0.000000e+00> : vector<16x512xf32>
    %147 = tpu.matmul %146, %3, %cst_76 {dimension_numbers = #tpu.dot_dimension_numbers<[1], [0], [0], [1], [0, 0, 1, 1], [], []>} : vector<16x128xbf16>, vector<128x512xbf16>, vector<16x512xf32> -> vector<16x512xf32>
    %148 = arith.addf %147, %7 : vector<16x512xf32>
    %c0_77 = arith.constant 0 : index
    %c0_78 = arith.constant 0 : index
    %149 = vector.load %arg7[%c0_77, %c0_78] : memref<16x128xbf16, #tpu.memory_space<vmem>>, vector<16x128xbf16>
    %c0_79 = arith.constant 0 : index
    %c0_80 = arith.constant 0 : index
    %150 = vector.load %arg8[%c0_79, %c0_80] : memref<16x128xf32, #tpu.memory_space<vmem>>, vector<16x128xf32>
    %cst_81 = arith.constant dense<0.000000e+00> : vector<16x512xf32>
    %151 = tpu.matmul %149, %4, %cst_81 {dimension_numbers = #tpu.dot_dimension_numbers<[1], [0], [0], [1], [0, 0, 1, 1], [], []>} : vector<16x128xbf16>, vector<128x512xbf16>, vector<16x512xf32> -> vector<16x512xf32>
    %152 = arith.addf %148, %151 : vector<16x512xf32>
    %153 = vector.extract_strided_slice %152 {offsets = [0, 0], sizes = [16, 384], strides = [1, 1]} : vector<16x512xf32> to vector<16x384xf32>
    %cst_82 = arith.constant 5.000000e-01 : f32
    %154 = vector.broadcast %cst_82 : f32 to vector<16x384xf32>
    %155 = arith.mulf %154, %153 : vector<16x384xf32>
    %156 = math.tanh %155 : vector<16x384xf32>
    %cst_83 = arith.constant 5.000000e-01 : f32
    %157 = vector.broadcast %cst_83 : f32 to vector<16x384xf32>
    %158 = arith.mulf %157, %156 : vector<16x384xf32>
    %cst_84 = arith.constant 5.000000e-01 : f32
    %159 = vector.broadcast %cst_84 : f32 to vector<16x384xf32>
    %160 = arith.addf %158, %159 : vector<16x384xf32>
    %161 = vector.extract_strided_slice %160 {offsets = [0, 0], sizes = [16, 128], strides = [1, 1]} : vector<16x384xf32> to vector<16x128xf32>
    %162 = vector.extract_strided_slice %160 {offsets = [0, 128], sizes = [16, 128], strides = [1, 1]} : vector<16x384xf32> to vector<16x128xf32>
    %163 = vector.extract_strided_slice %160 {offsets = [0, 256], sizes = [16, 128], strides = [1, 1]} : vector<16x384xf32> to vector<16x128xf32>
    %164 = vector.extract_strided_slice %152 {offsets = [0, 384], sizes = [16, 128], strides = [1, 1]} : vector<16x512xf32> to vector<16x128xf32>
    %165 = math.tanh %164 : vector<16x128xf32>
    %166 = arith.mulf %162, %150 : vector<16x128xf32>
    %167 = arith.mulf %161, %165 : vector<16x128xf32>
    %168 = arith.addf %166, %167 : vector<16x128xf32>
    %169 = math.tanh %168 : vector<16x128xf32>
    %170 = arith.mulf %163, %169 : vector<16x128xf32>
    %c0_85 = arith.constant 0 : index
    %c0_86 = arith.constant 0 : index
    %171 = vector.load %arg8[%c0_85, %c0_86] : memref<16x128xf32, #tpu.memory_space<vmem>>, vector<16x128xf32>
    tpu.vector_store %arg8[%c0_85, %c0_86], %168 {strides = array<i32>} : memref<16x128xf32, #tpu.memory_space<vmem>>, vector<16x128xf32>,
    %172 = arith.truncf %170 : vector<16x128xf32> to vector<16x128xbf16>
    %c0_87 = arith.constant 0 : index
    %c0_88 = arith.constant 0 : index
    %173 = vector.load %arg7[%c0_87, %c0_88] : memref<16x128xbf16, #tpu.memory_space<vmem>>, vector<16x128xbf16>
    tpu.vector_store %arg7[%c0_87, %c0_88], %172 {strides = array<i32>} : memref<16x128xbf16, #tpu.memory_space<vmem>>, vector<16x128xbf16>,
    %174 = arith.index_cast %c4_i32 : i32 to index
    %c0_89 = arith.constant 0 : index
    %c0_90 = arith.constant 0 : index
    %175 = vector.load %arg6[%174, %c0_89, %c0_90] : memref<8x16x128xf32, #tpu.memory_space<vmem>>, vector<1x16x128xf32>
    %176 = vector.shape_cast %175 : vector<1x16x128xf32> to vector<16x128xf32>
    %177 = vector.shape_cast %170 : vector<16x128xf32> to vector<1x16x128xf32>
    tpu.vector_store %arg6[%174, %c0_89, %c0_90], %177 {strides = array<i32>} : memref<8x16x128xf32, #tpu.memory_space<vmem>>, vector<1x16x128xf32>,
    %c5_i32 = arith.constant 5 : i32
    %178 = arith.index_cast %c5_i32 : i32 to index
    %c0_91 = arith.constant 0 : index
    %c0_92 = arith.constant 0 : index
    %179 = vector.load %arg2[%178, %c0_91, %c0_92] : memref<8x16x128xbf16, #tpu.memory_space<vmem>>, vector<1x16x128xbf16>
    %180 = vector.shape_cast %179 : vector<1x16x128xbf16> to vector<16x128xbf16>
    %cst_93 = arith.constant dense<0.000000e+00> : vector<16x512xf32>
    %181 = tpu.matmul %180, %3, %cst_93 {dimension_numbers = #tpu.dot_dimension_numbers<[1], [0], [0], [1], [0, 0, 1, 1], [], []>} : vector<16x128xbf16>, vector<128x512xbf16>, vector<16x512xf32> -> vector<16x512xf32>
    %182 = arith.addf %181, %7 : vector<16x512xf32>
    %c0_94 = arith.constant 0 : index
    %c0_95 = arith.constant 0 : index
    %183 = vector.load %arg7[%c0_94, %c0_95] : memref<16x128xbf16, #tpu.memory_space<vmem>>, vector<16x128xbf16>
    %c0_96 = arith.constant 0 : index
    %c0_97 = arith.constant 0 : index
    %184 = vector.load %arg8[%c0_96, %c0_97] : memref<16x128xf32, #tpu.memory_space<vmem>>, vector<16x128xf32>
    %cst_98 = arith.constant dense<0.000000e+00> : vector<16x512xf32>
    %185 = tpu.matmul %183, %4, %cst_98 {dimension_numbers = #tpu.dot_dimension_numbers<[1], [0], [0], [1], [0, 0, 1, 1], [], []>} : vector<16x128xbf16>, vector<128x512xbf16>, vector<16x512xf32> -> vector<16x512xf32>
    %186 = arith.addf %182, %185 : vector<16x512xf32>
    %187 = vector.extract_strided_slice %186 {offsets = [0, 0], sizes = [16, 384], strides = [1, 1]} : vector<16x512xf32> to vector<16x384xf32>
    %cst_99 = arith.constant 5.000000e-01 : f32
    %188 = vector.broadcast %cst_99 : f32 to vector<16x384xf32>
    %189 = arith.mulf %188, %187 : vector<16x384xf32>
    %190 = math.tanh %189 : vector<16x384xf32>
    %cst_100 = arith.constant 5.000000e-01 : f32
    %191 = vector.broadcast %cst_100 : f32 to vector<16x384xf32>
    %192 = arith.mulf %191, %190 : vector<16x384xf32>
    %cst_101 = arith.constant 5.000000e-01 : f32
    %193 = vector.broadcast %cst_101 : f32 to vector<16x384xf32>
    %194 = arith.addf %192, %193 : vector<16x384xf32>
    %195 = vector.extract_strided_slice %194 {offsets = [0, 0], sizes = [16, 128], strides = [1, 1]} : vector<16x384xf32> to vector<16x128xf32>
    %196 = vector.extract_strided_slice %194 {offsets = [0, 128], sizes = [16, 128], strides = [1, 1]} : vector<16x384xf32> to vector<16x128xf32>
    %197 = vector.extract_strided_slice %194 {offsets = [0, 256], sizes = [16, 128], strides = [1, 1]} : vector<16x384xf32> to vector<16x128xf32>
    %198 = vector.extract_strided_slice %186 {offsets = [0, 384], sizes = [16, 128], strides = [1, 1]} : vector<16x512xf32> to vector<16x128xf32>
    %199 = math.tanh %198 : vector<16x128xf32>
    %200 = arith.mulf %196, %184 : vector<16x128xf32>
    %201 = arith.mulf %195, %199 : vector<16x128xf32>
    %202 = arith.addf %200, %201 : vector<16x128xf32>
    %203 = math.tanh %202 : vector<16x128xf32>
    %204 = arith.mulf %197, %203 : vector<16x128xf32>
    %c0_102 = arith.constant 0 : index
    %c0_103 = arith.constant 0 : index
    %205 = vector.load %arg8[%c0_102, %c0_103] : memref<16x128xf32, #tpu.memory_space<vmem>>, vector<16x128xf32>
    tpu.vector_store %arg8[%c0_102, %c0_103], %202 {strides = array<i32>} : memref<16x128xf32, #tpu.memory_space<vmem>>, vector<16x128xf32>,
    %206 = arith.truncf %204 : vector<16x128xf32> to vector<16x128xbf16>
    %c0_104 = arith.constant 0 : index
    %c0_105 = arith.constant 0 : index
    %207 = vector.load %arg7[%c0_104, %c0_105] : memref<16x128xbf16, #tpu.memory_space<vmem>>, vector<16x128xbf16>
    tpu.vector_store %arg7[%c0_104, %c0_105], %206 {strides = array<i32>} : memref<16x128xbf16, #tpu.memory_space<vmem>>, vector<16x128xbf16>,
    %208 = arith.index_cast %c5_i32 : i32 to index
    %c0_106 = arith.constant 0 : index
    %c0_107 = arith.constant 0 : index
    %209 = vector.load %arg6[%208, %c0_106, %c0_107] : memref<8x16x128xf32, #tpu.memory_space<vmem>>, vector<1x16x128xf32>
    %210 = vector.shape_cast %209 : vector<1x16x128xf32> to vector<16x128xf32>
    %211 = vector.shape_cast %204 : vector<16x128xf32> to vector<1x16x128xf32>
    tpu.vector_store %arg6[%208, %c0_106, %c0_107], %211 {strides = array<i32>} : memref<8x16x128xf32, #tpu.memory_space<vmem>>, vector<1x16x128xf32>,
    %c6_i32 = arith.constant 6 : i32
    %212 = arith.index_cast %c6_i32 : i32 to index
    %c0_108 = arith.constant 0 : index
    %c0_109 = arith.constant 0 : index
    %213 = vector.load %arg2[%212, %c0_108, %c0_109] : memref<8x16x128xbf16, #tpu.memory_space<vmem>>, vector<1x16x128xbf16>
    %214 = vector.shape_cast %213 : vector<1x16x128xbf16> to vector<16x128xbf16>
    %cst_110 = arith.constant dense<0.000000e+00> : vector<16x512xf32>
    %215 = tpu.matmul %214, %3, %cst_110 {dimension_numbers = #tpu.dot_dimension_numbers<[1], [0], [0], [1], [0, 0, 1, 1], [], []>} : vector<16x128xbf16>, vector<128x512xbf16>, vector<16x512xf32> -> vector<16x512xf32>
    %216 = arith.addf %215, %7 : vector<16x512xf32>
    %c0_111 = arith.constant 0 : index
    %c0_112 = arith.constant 0 : index
    %217 = vector.load %arg7[%c0_111, %c0_112] : memref<16x128xbf16, #tpu.memory_space<vmem>>, vector<16x128xbf16>
    %c0_113 = arith.constant 0 : index
    %c0_114 = arith.constant 0 : index
    %218 = vector.load %arg8[%c0_113, %c0_114] : memref<16x128xf32, #tpu.memory_space<vmem>>, vector<16x128xf32>
    %cst_115 = arith.constant dense<0.000000e+00> : vector<16x512xf32>
    %219 = tpu.matmul %217, %4, %cst_115 {dimension_numbers = #tpu.dot_dimension_numbers<[1], [0], [0], [1], [0, 0, 1, 1], [], []>} : vector<16x128xbf16>, vector<128x512xbf16>, vector<16x512xf32> -> vector<16x512xf32>
    %220 = arith.addf %216, %219 : vector<16x512xf32>
    %221 = vector.extract_strided_slice %220 {offsets = [0, 0], sizes = [16, 384], strides = [1, 1]} : vector<16x512xf32> to vector<16x384xf32>
    %cst_116 = arith.constant 5.000000e-01 : f32
    %222 = vector.broadcast %cst_116 : f32 to vector<16x384xf32>
    %223 = arith.mulf %222, %221 : vector<16x384xf32>
    %224 = math.tanh %223 : vector<16x384xf32>
    %cst_117 = arith.constant 5.000000e-01 : f32
    %225 = vector.broadcast %cst_117 : f32 to vector<16x384xf32>
    %226 = arith.mulf %225, %224 : vector<16x384xf32>
    %cst_118 = arith.constant 5.000000e-01 : f32
    %227 = vector.broadcast %cst_118 : f32 to vector<16x384xf32>
    %228 = arith.addf %226, %227 : vector<16x384xf32>
    %229 = vector.extract_strided_slice %228 {offsets = [0, 0], sizes = [16, 128], strides = [1, 1]} : vector<16x384xf32> to vector<16x128xf32>
    %230 = vector.extract_strided_slice %228 {offsets = [0, 128], sizes = [16, 128], strides = [1, 1]} : vector<16x384xf32> to vector<16x128xf32>
    %231 = vector.extract_strided_slice %228 {offsets = [0, 256], sizes = [16, 128], strides = [1, 1]} : vector<16x384xf32> to vector<16x128xf32>
    %232 = vector.extract_strided_slice %220 {offsets = [0, 384], sizes = [16, 128], strides = [1, 1]} : vector<16x512xf32> to vector<16x128xf32>
    %233 = math.tanh %232 : vector<16x128xf32>
    %234 = arith.mulf %230, %218 : vector<16x128xf32>
    %235 = arith.mulf %229, %233 : vector<16x128xf32>
    %236 = arith.addf %234, %235 : vector<16x128xf32>
    %237 = math.tanh %236 : vector<16x128xf32>
    %238 = arith.mulf %231, %237 : vector<16x128xf32>
    %c0_119 = arith.constant 0 : index
    %c0_120 = arith.constant 0 : index
    %239 = vector.load %arg8[%c0_119, %c0_120] : memref<16x128xf32, #tpu.memory_space<vmem>>, vector<16x128xf32>
    tpu.vector_store %arg8[%c0_119, %c0_120], %236 {strides = array<i32>} : memref<16x128xf32, #tpu.memory_space<vmem>>, vector<16x128xf32>,
    %240 = arith.truncf %238 : vector<16x128xf32> to vector<16x128xbf16>
    %c0_121 = arith.constant 0 : index
    %c0_122 = arith.constant 0 : index
    %241 = vector.load %arg7[%c0_121, %c0_122] : memref<16x128xbf16, #tpu.memory_space<vmem>>, vector<16x128xbf16>
    tpu.vector_store %arg7[%c0_121, %c0_122], %240 {strides = array<i32>} : memref<16x128xbf16, #tpu.memory_space<vmem>>, vector<16x128xbf16>,
    %242 = arith.index_cast %c6_i32 : i32 to index
    %c0_123 = arith.constant 0 : index
    %c0_124 = arith.constant 0 : index
    %243 = vector.load %arg6[%242, %c0_123, %c0_124] : memref<8x16x128xf32, #tpu.memory_space<vmem>>, vector<1x16x128xf32>
    %244 = vector.shape_cast %243 : vector<1x16x128xf32> to vector<16x128xf32>
    %245 = vector.shape_cast %238 : vector<16x128xf32> to vector<1x16x128xf32>
    tpu.vector_store %arg6[%242, %c0_123, %c0_124], %245 {strides = array<i32>} : memref<8x16x128xf32, #tpu.memory_space<vmem>>, vector<1x16x128xf32>,
    %c7_i32 = arith.constant 7 : i32
    %246 = arith.index_cast %c7_i32 : i32 to index
    %c0_125 = arith.constant 0 : index
    %c0_126 = arith.constant 0 : index
    %247 = vector.load %arg2[%246, %c0_125, %c0_126] : memref<8x16x128xbf16, #tpu.memory_space<vmem>>, vector<1x16x128xbf16>
    %248 = vector.shape_cast %247 : vector<1x16x128xbf16> to vector<16x128xbf16>
    %cst_127 = arith.constant dense<0.000000e+00> : vector<16x512xf32>
    %249 = tpu.matmul %248, %3, %cst_127 {dimension_numbers = #tpu.dot_dimension_numbers<[1], [0], [0], [1], [0, 0, 1, 1], [], []>} : vector<16x128xbf16>, vector<128x512xbf16>, vector<16x512xf32> -> vector<16x512xf32>
    %250 = arith.addf %249, %7 : vector<16x512xf32>
    %c0_128 = arith.constant 0 : index
    %c0_129 = arith.constant 0 : index
    %251 = vector.load %arg7[%c0_128, %c0_129] : memref<16x128xbf16, #tpu.memory_space<vmem>>, vector<16x128xbf16>
    %c0_130 = arith.constant 0 : index
    %c0_131 = arith.constant 0 : index
    %252 = vector.load %arg8[%c0_130, %c0_131] : memref<16x128xf32, #tpu.memory_space<vmem>>, vector<16x128xf32>
    %cst_132 = arith.constant dense<0.000000e+00> : vector<16x512xf32>
    %253 = tpu.matmul %251, %4, %cst_132 {dimension_numbers = #tpu.dot_dimension_numbers<[1], [0], [0], [1], [0, 0, 1, 1], [], []>} : vector<16x128xbf16>, vector<128x512xbf16>, vector<16x512xf32> -> vector<16x512xf32>
    %254 = arith.addf %250, %253 : vector<16x512xf32>
    %255 = vector.extract_strided_slice %254 {offsets = [0, 0], sizes = [16, 384], strides = [1, 1]} : vector<16x512xf32> to vector<16x384xf32>
    %cst_133 = arith.constant 5.000000e-01 : f32
    %256 = vector.broadcast %cst_133 : f32 to vector<16x384xf32>
    %257 = arith.mulf %256, %255 : vector<16x384xf32>
    %258 = math.tanh %257 : vector<16x384xf32>
    %cst_134 = arith.constant 5.000000e-01 : f32
    %259 = vector.broadcast %cst_134 : f32 to vector<16x384xf32>
    %260 = arith.mulf %259, %258 : vector<16x384xf32>
    %cst_135 = arith.constant 5.000000e-01 : f32
    %261 = vector.broadcast %cst_135 : f32 to vector<16x384xf32>
    %262 = arith.addf %260, %261 : vector<16x384xf32>
    %263 = vector.extract_strided_slice %262 {offsets = [0, 0], sizes = [16, 128], strides = [1, 1]} : vector<16x384xf32> to vector<16x128xf32>
    %264 = vector.extract_strided_slice %262 {offsets = [0, 128], sizes = [16, 128], strides = [1, 1]} : vector<16x384xf32> to vector<16x128xf32>
    %265 = vector.extract_strided_slice %262 {offsets = [0, 256], sizes = [16, 128], strides = [1, 1]} : vector<16x384xf32> to vector<16x128xf32>
    %266 = vector.extract_strided_slice %254 {offsets = [0, 384], sizes = [16, 128], strides = [1, 1]} : vector<16x512xf32> to vector<16x128xf32>
    %267 = math.tanh %266 : vector<16x128xf32>
    %268 = arith.mulf %264, %252 : vector<16x128xf32>
    %269 = arith.mulf %263, %267 : vector<16x128xf32>
    %270 = arith.addf %268, %269 : vector<16x128xf32>
    %271 = math.tanh %270 : vector<16x128xf32>
    %272 = arith.mulf %265, %271 : vector<16x128xf32>
    %c0_136 = arith.constant 0 : index
    %c0_137 = arith.constant 0 : index
    %273 = vector.load %arg8[%c0_136, %c0_137] : memref<16x128xf32, #tpu.memory_space<vmem>>, vector<16x128xf32>
    tpu.vector_store %arg8[%c0_136, %c0_137], %270 {strides = array<i32>} : memref<16x128xf32, #tpu.memory_space<vmem>>, vector<16x128xf32>,
    %274 = arith.truncf %272 : vector<16x128xf32> to vector<16x128xbf16>
    %c0_138 = arith.constant 0 : index
    %c0_139 = arith.constant 0 : index
    %275 = vector.load %arg7[%c0_138, %c0_139] : memref<16x128xbf16, #tpu.memory_space<vmem>>, vector<16x128xbf16>
    tpu.vector_store %arg7[%c0_138, %c0_139], %274 {strides = array<i32>} : memref<16x128xbf16, #tpu.memory_space<vmem>>, vector<16x128xbf16>,
    %276 = arith.index_cast %c7_i32 : i32 to index
    %c0_140 = arith.constant 0 : index
    %c0_141 = arith.constant 0 : index
    %277 = vector.load %arg6[%276, %c0_140, %c0_141] : memref<8x16x128xf32, #tpu.memory_space<vmem>>, vector<1x16x128xf32>
    %278 = vector.shape_cast %277 : vector<1x16x128xf32> to vector<16x128xf32>
    %279 = vector.shape_cast %272 : vector<16x128xf32> to vector<1x16x128xf32>
    tpu.vector_store %arg6[%276, %c0_140, %c0_141], %279 {strides = array<i32>} : memref<8x16x128xf32, #tpu.memory_space<vmem>>, vector<1x16x128xf32>,
    %c8_i32 = arith.constant 8 : i32
    return
  }
  func.func @transform_0(%arg0: i32, %arg1: i32) -> (i32, i32, i32) {
    %c0_i32 = arith.constant 0 : i32
    %c0_i32_0 = arith.constant 0 : i32
    return %arg1, %arg0, %c0_i32 : i32, i32, i32
  }
  func.func @transform_1(%arg0: i32, %arg1: i32) -> (i32, i32) {
    %c0_i32 = arith.constant 0 : i32
    %c0_i32_0 = arith.constant 0 : i32
    %c0_i32_1 = arith.constant 0 : i32
    return %c0_i32, %c0_i32_0 : i32, i32
  }
  func.func @transform_2(%arg0: i32, %arg1: i32) -> (i32, i32) {
    %c0_i32 = arith.constant 0 : i32
    %c0_i32_0 = arith.constant 0 : i32
    %c0_i32_1 = arith.constant 0 : i32
    return %c0_i32, %c0_i32_0 : i32, i32
  }
  func.func @transform_3(%arg0: i32, %arg1: i32) -> (i32, i32) {
    %c0_i32 = arith.constant 0 : i32
    %c0_i32_0 = arith.constant 0 : i32
    %c0_i32_1 = arith.constant 0 : i32
    return %c0_i32, %c0_i32_0 : i32, i32
  }
  func.func @transform_4(%arg0: i32, %arg1: i32) -> (i32, i32, i32) {
    %c0_i32 = arith.constant 0 : i32
    %c0_i32_0 = arith.constant 0 : i32
    return %arg1, %arg0, %c0_i32 : i32, i32, i32
  }
}

</mosaic_0001>

<bundles_post_ra>
// kernel: size_tracking_lstm_forward.1
= control target key start
LH: loop header
LB: loop body
LE: loop exit
PB: predicated region body
PF: predicated region fallthrough
CT: control target
= control target key end

     0   :  { %v4290_v1 = vmov 0   ;;  %s4285_s1 = inlined_call_operand.vmem [shape: bf16[128,512], index: 1, kind: input, shape index: {}]   ;;  %s4286_s2 = inlined_call_operand.vmem [shape: bf16[128,512], index: 2, kind: input, shape index: {}]   ;;  %s4287_s0 = inlined_call_operand.vmem [shape: bf16[8,16,128], index: 0, kind: input, shape index: {}]   ;;  %s4288_s3 = inlined_call_operand.vmem [shape: f32[1,512], index: 3, kind: input, shape index: {}]   ;;  %s4289_s4 = inlined_call_operand.vmem [shape: f32[8,16,128], index: 4, kind: output, shape index: {}]  }
   0x1   :  { %v2899_v0 = vld [vmem:[%s4285_s1 + $0x4] ss:$16 sps:$4 sm:$0xff]   ;;  %311 = vmatprep.mubr.bf16.mxu0 %v4290_v1  ;;  %354 = vmatprep.mubr.bf16.mxu1 %v4290_v1  ;;  %v2906_v2 = vld [vmem:[%s4285_s1 + $0xc] ss:$16 sps:$4 sm:$0xff]   ;;  %v2912_v3 = vld [vmem:[%s4285_s1] ss:$16 sps:$4 sm:$0xff]  }
   0x2   :  { %4405 = vst [vmem:[#allocation4_spill] sm:$0xff] %v2899_v0  ;;  %4406 = vst [vmem:[#allocation5_spill] sm:$0xff] %v2906_v2  ;;  %279 = vmatprep.subr.bf16.mxu0 %v2899_v0  ;;  %v2917_v4 = vld [vmem:[%s4285_s1 + $0x8] ss:$16 sps:$4 sm:$0xff]   ;;  %322 = vmatprep.subr.bf16.mxu1 %v2906_v2  ;;  %v2923_v5 = vld [vmem:[%s4285_s1 + $0x24] ss:$16 sps:$4 sm:$0xff]  }
   0x3   :  { %280 = vmatpush1.bf16.msra.mxu0 %v2912_v3  ;;  %323 = vmatpush1.bf16.msra.mxu1 %v2917_v4  ;;  %v2930_v6 = vld [vmem:[%s4285_s1 + $0x2c] ss:$16 sps:$4 sm:$0xff]   ;;  %v2935_v7 = vld [vmem:[%s4285_s1 + $0x20] ss:$16 sps:$4 sm:$0xff]   ;;  %v2941_v8 = vld [vmem:[%s4285_s1 + $0x28] ss:$16 sps:$4 sm:$0xff]  }
   0x4   :  { %281 = vmatprep.subr.bf16.mxu0 %v2923_v5  ;;  %324 = vmatprep.subr.bf16.mxu1 %v2930_v6  ;;  %v2947_v9 = vld [vmem:[%s4285_s1 + $0x44] ss:$16 sps:$4 sm:$0xff]   ;;  %v2952_v10 = vld [vmem:[%s4285_s1 + $0x4c] ss:$16 sps:$4 sm:$0xff]   ;;  %v2957_v11 = vld [vmem:[%s4285_s1 + $0x40] ss:$16 sps:$4 sm:$0xff]  }
   0x5   :  { %v2962_v12 = vld [vmem:[%s4285_s1 + $0x48] ss:$16 sps:$4 sm:$0xff]   ;;  %v2969_v13 = vld [vmem:[%s4285_s1 + $0x64] ss:$16 sps:$4 sm:$0xff]   ;;  %v2976_v14 = vld [vmem:[%s4285_s1 + $0x6c] ss:$16 sps:$4 sm:$0xff]  }
   0x6   :  { %v2981_v15 = vld [vmem:[%s4285_s1 + $0x60] ss:$16 sps:$4 sm:$0xff]   ;;  %v2988_v16 = vld [vmem:[%s4285_s1 + $0x68] ss:$16 sps:$4 sm:$0xff]   ;;  %v2993_v17 = vld [vmem:[%s4285_s1 + $0x84] ss:$16 sps:$4 sm:$0xff]  }
   0x7   :  { %282 = vmatpush1.bf16.msra.mxu0 %v2935_v7  ;;  %325 = vmatpush1.bf16.msra.mxu1 %v2941_v8  ;;  %v3000_v18 = vld [vmem:[%s4285_s1 + $0x8c] ss:$16 sps:$4 sm:$0xff]   ;;  %v3005_v19 = vld [vmem:[%s4285_s1 + $0x80] ss:$16 sps:$4 sm:$0xff]   ;;  %v3010_v20 = vld [vmem:[%s4285_s1 + $0x88] ss:$16 sps:$4 sm:$0xff]  }
   0x8   :  { %283 = vmatprep.subr.bf16.mxu0 %v2947_v9  ;;  %326 = vmatprep.subr.bf16.mxu1 %v2952_v10  ;;  %v3017_v21 = vld [vmem:[%s4285_s1 + $0xa4] ss:$16 sps:$4 sm:$0xff]   ;;  %v3024_v22 = vld [vmem:[%s4285_s1 + $0xac] ss:$16 sps:$4 sm:$0xff]   ;;  %v3029_v23 = vld [vmem:[%s4285_s1 + $0xa0] ss:$16 sps:$4 sm:$0xff]  }
   0x9   :  { %v3036_v24 = vld [vmem:[%s4285_s1 + $0xa8] ss:$16 sps:$4 sm:$0xff]   ;;  %v3041_v25 = vld [vmem:[%s4285_s1 + $0xc4] ss:$16 sps:$4 sm:$0xff]   ;;  %v3048_v26 = vld [vmem:[%s4285_s1 + $0xcc] ss:$16 sps:$4 sm:$0xff]  }
   0xa   :  { %4407 = vst [vmem:[#allocation6_spill] sm:$0xff] %v3048_v26  ;;  %v3055_v27 = vld [vmem:[%s4285_s1 + $0xc0] ss:$16 sps:$4 sm:$0xff]   ;;  %v3060_v28 = vld [vmem:[%s4285_s1 + $0xc8] ss:$16 sps:$4 sm:$0xff]  }
   0xb   :  { %284 = vmatpush1.bf16.msra.mxu0 %v2957_v11  ;;  %327 = vmatpush1.bf16.msra.mxu1 %v2962_v12  ;;  %v3065_v29 = vld [vmem:[%s4285_s1 + $0xe4] ss:$16 sps:$4 sm:$0xff]   ;;  %v3072_v30 = vld [vmem:[%s4285_s1 + $0xec] ss:$16 sps:$4 sm:$0xff]   ;;  %v3077_v31 = vld [vmem:[%s4285_s1 + $0xe0] ss:$16 sps:$4 sm:$0xff]  }
   0xc   :  { %285 = vmatprep.subr.bf16.mxu0 %v2969_v13  ;;  %328 = vmatprep.subr.bf16.mxu1 %v2976_v14  ;;  %v3084_v32 = vld [vmem:[%s4285_s1 + $0xe8] ss:$16 sps:$4 sm:$0xff]   ;;  %v3091_v33 = vld [vmem:[%s4286_s2 + $0x4] ss:$16 sps:$4 sm:$0xff]   ;;  %v3096_v34 = vld [vmem:[%s4286_s2 + $0xc] ss:$16 sps:$4 sm:$0xff]  }
   0xd   :  { %v2594_v35 = vld [vmem:[%s4287_s0] sm:$0xff]   ;;  %v3111_v37 = vld [vmem:[%s4286_s2 + $0x8] ss:$16 sps:$4 sm:$0xff]   ;;  %v3123_v39 = vld [vmem:[%s4286_s2 + $0x2c] ss:$16 sps:$4 sm:$0xff]  }
   0xe   :  { %v3106_v36 = vld [vmem:[%s4286_s2] ss:$16 sps:$4 sm:$0xff]   ;;  %v3116_v38 = vld [vmem:[%s4286_s2 + $0x24] ss:$16 sps:$4 sm:$0xff]   ;;  %v3135_v41 = vld [vmem:[%s4286_s2 + $0x28] ss:$16 sps:$4 sm:$0xff]  }
   0xf   :  { %286 = vmatpush1.bf16.msra.mxu0 %v2981_v15  ;;  %329 = vmatpush1.bf16.msra.mxu1 %v2988_v16  ;;  %v3128_v40 = vld [vmem:[%s4286_s2 + $0x20] ss:$16 sps:$4 sm:$0xff]   ;;  %v3142_v42 = vld [vmem:[%s4286_s2 + $0x44] ss:$16 sps:$4 sm:$0xff]   ;;  %v3147_v43 = vld [vmem:[%s4286_s2 + $0x4c] ss:$16 sps:$4 sm:$0xff]  }
  0x10   :  { %287 = vmatprep.subr.bf16.mxu0 %v2993_v17  ;;  %330 = vmatprep.subr.bf16.mxu1 %v3000_v18  ;;  %v3156_v44 = vld [vmem:[%s4286_s2 + $0x40] ss:$16 sps:$4 sm:$0xff]   ;;  %v3161_v45 = vld [vmem:[%s4286_s2 + $0x48] ss:$16 sps:$4 sm:$0xff]   ;;  %v3166_v46 = vld [vmem:[%s4286_s2 + $0x64] ss:$16 sps:$4 sm:$0xff]  }
  0x11   :  { %4408 = vst [vmem:[#allocation7_spill] sm:$0xff] %v3156_v44  ;;  %4409 = vst [vmem:[#allocation8_spill] sm:$0xff] %v3161_v45  ;;  %v3173_v47 = vld [vmem:[%s4286_s2 + $0x6c] ss:$16 sps:$4 sm:$0xff]   ;;  %v3178_v48 = vld [vmem:[%s4286_s2 + $0x60] ss:$16 sps:$4 sm:$0xff]  }
  0x12   :  { %4410 = vst [vmem:[#allocation9_spill] sm:$0xff] %v3166_v46  ;;  %4411 = vst [vmem:[#allocation10_spill] sm:$0xff] %v3173_v47  ;;  %v3183_v49 = vld [vmem:[%s4286_s2 + $0x68] ss:$16 sps:$4 sm:$0xff]   ;;  %v3188_v50 = vld [vmem:[%s4286_s2 + $0x84] ss:$16 sps:$4 sm:$0xff]  }
  0x13   :  { %288 = vmatpush1.bf16.msra.mxu0 %v3005_v19  ;;  %331 = vmatpush1.bf16.msra.mxu1 %v3010_v20  ;;  %4412 = vst [vmem:[#allocation11_spill] sm:$0xff] %v3178_v48  ;;  %4413 = vst [vmem:[#allocation12_spill] sm:$0xff] %v3183_v49  ;;  %v3193_v51 = vld [vmem:[%s4286_s2 + $0x8c] ss:$16 sps:$4 sm:$0xff]   ;;  %v3202_v52 = vld [vmem:[%s4286_s2 + $0x80] ss:$16 sps:$4 sm:$0xff]  }
  0x14   :  { %289 = vmatprep.subr.bf16.mxu0 %v3017_v21  ;;  %332 = vmatprep.subr.bf16.mxu1 %v3024_v22  ;;  %4414 = vst [vmem:[#allocation13_spill] sm:$0xff] %v3188_v50  ;;  %4415 = vst [vmem:[#allocation14_spill] sm:$0xff] %v3193_v51  ;;  %v3209_v53 = vld [vmem:[%s4286_s2 + $0x88] ss:$16 sps:$4 sm:$0xff]   ;;  %v3216_v54 = vld [vmem:[%s4286_s2 + $0xa4] ss:$16 sps:$4 sm:$0xff]  }
  0x15   :  { %4416 = vst [vmem:[#allocation15_spill] sm:$0xff] %v3202_v52  ;;  %4417 = vst [vmem:[#allocation16_spill] sm:$0xff] %v3209_v53  ;;  %v3221_v55 = vld [vmem:[%s4286_s2 + $0xac] ss:$16 sps:$4 sm:$0xff]   ;;  %v3228_v56 = vld [vmem:[%s4286_s2 + $0xa0] ss:$16 sps:$4 sm:$0xff]  }
  0x16   :  { %4418 = vst [vmem:[#allocation17_spill] sm:$0xff] %v3216_v54  ;;  %4419 = vst [vmem:[#allocation18_spill] sm:$0xff] %v3221_v55  ;;  %v3233_v57 = vld [vmem:[%s4286_s2 + $0xa8] ss:$16 sps:$4 sm:$0xff]   ;;  %v3240_v58 = vld [vmem:[%s4286_s2 + $0xc4] ss:$16 sps:$4 sm:$0xff]  }
  0x17   :  { %290 = vmatpush1.bf16.msra.mxu0 %v3029_v23  ;;  %333 = vmatpush1.bf16.msra.mxu1 %v3036_v24  ;;  %4420 = vst [vmem:[#allocation19_spill] sm:$0xff] %v3228_v56  ;;  %4421 = vst [vmem:[#allocation20_spill] sm:$0xff] %v3233_v57  ;;  %v3245_v59 = vld [vmem:[%s4286_s2 + $0xcc] ss:$16 sps:$4 sm:$0xff]   ;;  %v3252_v60 = vld [vmem:[%s4286_s2 + $0xc0] ss:$16 sps:$4 sm:$0xff]  }
  0x18   :  { %291 = vmatprep.subr.bf16.mxu0 %v3041_v25  ;;  %334 = vmatprep.subr.bf16.mxu1 %v3048_v26  ;;  %4422 = vst [vmem:[#allocation21_spill] sm:$0xff] %v3240_v58  ;;  %4423 = vst [vmem:[#allocation22_spill] sm:$0xff] %v3245_v59  ;;  %v3257_v61 = vld [vmem:[%s4286_s2 + $0xc8] ss:$16 sps:$4 sm:$0xff]   ;;  %v3264_v62 = vld [vmem:[%s4286_s2 + $0xe4] ss:$16 sps:$4 sm:$0xff]  }
  0x19   :  { %4424 = vst [vmem:[#allocation23_spill] sm:$0xff] %v3252_v60  ;;  %4425 = vst [vmem:[#allocation24_spill] sm:$0xff] %v3257_v61  ;;  %v3269_v63 = vld [vmem:[%s4286_s2 + $0xec] ss:$16 sps:$4 sm:$0xff]  }
  0x1a   :  { %4426 = vst [vmem:[#allocation25_spill] sm:$0xff] %v3264_v62  ;;  %4427 = vst [vmem:[#allocation26_spill] sm:$0xff] %v3269_v63 }
  0x1b   :  { %292 = vmatpush1.bf16.msra.mxu0 %v3055_v27  ;;  %335 = vmatpush1.bf16.msra.mxu1 %v3060_v28 }
  0x1c   :  { %293 = vmatprep.subr.bf16.mxu0 %v3065_v29  ;;  %336 = vmatprep.subr.bf16.mxu1 %v3072_v30 }
  0x1f   :  { %294 = vmatpush1.bf16.msra.mxu0 %v3077_v31  ;;  %337 = vmatpush1.bf16.msra.mxu1 %v3084_v32 }
  0x20   :  { %528 = vmatprep.subr.bf16.mxu0 %v3091_v33  ;;  %571 = vmatprep.subr.bf16.mxu1 %v3096_v34 }
  0x22   :  { %312 = vmatmul.mubr.bf16.vlgmr.msra.gmra.mrb[0].mxu0 %v2594_v35  ;;  %355 = vmatmul.mubr.bf16.vlgmr.msra.gmra.mrb[0].mxu1 %v2594_v35  ;;  %v3276_v35 = vld [vmem:[%s4286_s2 + $0xe0] ss:$16 sps:$4 sm:$0xff]  }
  0x23   :  { %529 = vmatpush1.bf16.msra.mxu0 %v3106_v36  ;;  %572 = vmatpush1.bf16.msra.mxu1 %v3111_v37  ;;  %4428 = vst [vmem:[#allocation27_spill] sm:$0xff] %v3276_v35 }
  0x24   :  { %530 = vmatprep.subr.bf16.mxu0 %v3116_v38  ;;  %573 = vmatprep.subr.bf16.mxu1 %v3123_v39 }
  0x25   :  { %560 = vmatprep.mubr.bf16.mxu0 %v4290_v1  ;;  %603 = vmatprep.mubr.bf16.mxu1 %v4290_v1  ;;  %v3281_v1 = vld [vmem:[%s4286_s2 + $0xe8] ss:$16 sps:$4 sm:$0xff]  }
  0x26   :  { %4429 = vst [vmem:[#allocation28_spill] sm:$0xff] %v3281_v1 }
  0x27   :  { %531 = vmatpush1.bf16.msra.mxu0 %v3128_v40  ;;  %574 = vmatpush1.bf16.msra.mxu1 %v3135_v41 }
  0x28   :  { %532 = vmatprep.subr.bf16.mxu0 %v3142_v42  ;;  %575 = vmatprep.subr.bf16.mxu1 %v3147_v43 }
  0x2b   :  { %533 = vmatpush1.bf16.msra.mxu0 %v3156_v44  ;;  %576 = vmatpush1.bf16.msra.mxu1 %v3161_v45 }
  0x2c   :  { %534 = vmatprep.subr.bf16.mxu0 %v3166_v46  ;;  %577 = vmatprep.subr.bf16.mxu1 %v3173_v47 }
  0x2f   :  { %535 = vmatpush1.bf16.msra.mxu0 %v3178_v48  ;;  %578 = vmatpush1.bf16.msra.mxu1 %v3183_v49 }
  0x30   :  { %536 = vmatprep.subr.bf16.mxu0 %v3188_v50  ;;  %579 = vmatprep.subr.bf16.mxu1 %v3193_v51 }
  0x33   :  { %537 = vmatpush1.bf16.msra.mxu0 %v3202_v52  ;;  %580 = vmatpush1.bf16.msra.mxu1 %v3209_v53 }
  0x34   :  { %538 = vmatprep.subr.bf16.mxu0 %v3216_v54  ;;  %581 = vmatprep.subr.bf16.mxu1 %v3221_v55 }
  0x37   :  { %539 = vmatpush1.bf16.msra.mxu0 %v3228_v56  ;;  %582 = vmatpush1.bf16.msra.mxu1 %v3233_v57 }
  0x38   :  { %540 = vmatprep.subr.bf16.mxu0 %v3240_v58  ;;  %583 = vmatprep.subr.bf16.mxu1 %v3245_v59 }
  0x3b   :  { %541 = vmatpush1.bf16.msra.mxu0 %v3252_v60  ;;  %584 = vmatpush1.bf16.msra.mxu1 %v3257_v61  ;;  %v4430_v61 = vmov 0  }
  0x3c   :  { %542 = vmatprep.subr.bf16.mxu0 %v3264_v62  ;;  %585 = vmatprep.subr.bf16.mxu1 %v3269_v63 }
  0x3f   :  { %543 = vmatpush1.bf16.msra.mxu0 %v3276_v35  ;;  %586 = vmatpush1.bf16.msra.mxu1 %v3281_v1 }
  0x40   :  { %673 = vmatprep.subr.bf16.mxu0 %v2899_v0  ;;  %716 = vmatprep.subr.bf16.mxu1 %v2906_v2 }
  0x42   :  { %561 = vmatmul.mubr.bf16.vlgmr.msra.gmra.mrb[0].mxu0 %v4430_v61  ;;  %604 = vmatmul.mubr.bf16.vlgmr.msra.gmra.mrb[0].mxu1 %v4430_v61 }
  0x43   :  { %674 = vmatpush1.bf16.msra.mxu0 %v2912_v3  ;;  %717 = vmatpush1.bf16.msra.mxu1 %v2917_v4 }
  0x44   :  { %675 = vmatprep.subr.bf16.mxu0 %v2923_v5  ;;  %718 = vmatprep.subr.bf16.mxu1 %v2930_v6 }
  0x45   :  { %705 = vmatprep.mubr.bf16.mxu0 %v4430_v61  ;;  %748 = vmatprep.mubr.bf16.mxu1 %v4430_v61 }
  0x47   :  { %676 = vmatpush1.bf16.msra.mxu0 %v2935_v7  ;;  %719 = vmatpush1.bf16.msra.mxu1 %v2941_v8 }
  0x48   :  { %677 = vmatprep.subr.bf16.mxu0 %v2947_v9  ;;  %720 = vmatprep.subr.bf16.mxu1 %v2952_v10 }
  0x4b   :  { %678 = vmatpush1.bf16.msra.mxu0 %v2957_v11  ;;  %721 = vmatpush1.bf16.msra.mxu1 %v2962_v12 }
  0x4c   :  { %679 = vmatprep.subr.bf16.mxu0 %v2969_v13  ;;  %722 = vmatprep.subr.bf16.mxu1 %v2976_v14 }
  0x4f   :  { %680 = vmatpush1.bf16.msra.mxu0 %v2981_v15  ;;  %723 = vmatpush1.bf16.msra.mxu1 %v2988_v16 }
  0x50   :  { %681 = vmatprep.subr.bf16.mxu0 %v2993_v17  ;;  %724 = vmatprep.subr.bf16.mxu1 %v3000_v18 }
  0x53   :  { %682 = vmatpush1.bf16.msra.mxu0 %v3005_v19  ;;  %725 = vmatpush1.bf16.msra.mxu1 %v3010_v20 }
  0x54   :  { %683 = vmatprep.subr.bf16.mxu0 %v3017_v21  ;;  %726 = vmatprep.subr.bf16.mxu1 %v3024_v22 }
  0x57   :  { %684 = vmatpush1.bf16.msra.mxu0 %v3029_v23  ;;  %727 = vmatpush1.bf16.msra.mxu1 %v3036_v24 }
  0x58   :  { %685 = vmatprep.subr.bf16.mxu0 %v3041_v25  ;;  %728 = vmatprep.subr.bf16.mxu1 %v3048_v26  ;;  %v2639_v26 = vld [vmem:[%s4287_s0 + $0x8] sm:$0xff]  }
  0x5b   :  { %686 = vmatpush1.bf16.msra.mxu0 %v3055_v27  ;;  %729 = vmatpush1.bf16.msra.mxu1 %v3060_v28 }
  0x5c   :  { %687 = vmatprep.subr.bf16.mxu0 %v3065_v29  ;;  %730 = vmatprep.subr.bf16.mxu1 %v3072_v30 }
  0x5f   :  { %688 = vmatpush1.bf16.msra.mxu0 %v3077_v31  ;;  %731 = vmatpush1.bf16.msra.mxu1 %v3084_v32 }
  0x60   :  { %762 = vmatprep.subr.bf16.mxu0 %v3091_v33  ;;  %805 = vmatprep.subr.bf16.mxu1 %v3096_v34 }
  0x62   :  { %706 = vmatmul.mubr.bf16.vlgmr.msra.gmra.mrb[4].mxu0 %v2639_v26  ;;  %749 = vmatmul.mubr.bf16.vlgmr.msra.gmra.mrb[4].mxu1 %v2639_v26  ;;  %v4431_v26 = vld [vmem:[#allocation24_spill] sm:$0xff] }
  0x63   :  { %763 = vmatpush1.bf16.msra.mxu0 %v3106_v36  ;;  %806 = vmatpush1.bf16.msra.mxu1 %v3111_v37 }
  0x64   :  { %764 = vmatprep.subr.bf16.mxu0 %v3116_v38  ;;  %807 = vmatprep.subr.bf16.mxu1 %v3123_v39 }
  0x65   :  { %794 = vmatprep.mubr.bf16.mxu0 %v4430_v61  ;;  %837 = vmatprep.mubr.bf16.mxu1 %v4430_v61 }
  0x67   :  { %765 = vmatpush1.bf16.msra.mxu0 %v3128_v40  ;;  %808 = vmatpush1.bf16.msra.mxu1 %v3135_v41 }
  0x68   :  { %766 = vmatprep.subr.bf16.mxu0 %v3142_v42  ;;  %809 = vmatprep.subr.bf16.mxu1 %v3147_v43 }
  0x6b   :  { %767 = vmatpush1.bf16.msra.mxu0 %v3156_v44  ;;  %810 = vmatpush1.bf16.msra.mxu1 %v3161_v45 }
  0x6c   :  { %768 = vmatprep.subr.bf16.mxu0 %v3166_v46  ;;  %811 = vmatprep.subr.bf16.mxu1 %v3173_v47 }
  0x6f   :  { %769 = vmatpush1.bf16.msra.mxu0 %v3178_v48  ;;  %812 = vmatpush1.bf16.msra.mxu1 %v3183_v49 }
  0x70   :  { %770 = vmatprep.subr.bf16.mxu0 %v3188_v50  ;;  %813 = vmatprep.subr.bf16.mxu1 %v3193_v51 }
  0x73   :  { %771 = vmatpush1.bf16.msra.mxu0 %v3202_v52  ;;  %814 = vmatpush1.bf16.msra.mxu1 %v3209_v53 }
  0x74   :  { %772 = vmatprep.subr.bf16.mxu0 %v3216_v54  ;;  %815 = vmatprep.subr.bf16.mxu1 %v3221_v55 }
  0x77   :  { %773 = vmatpush1.bf16.msra.mxu0 %v3228_v56  ;;  %816 = vmatpush1.bf16.msra.mxu1 %v3233_v57  ;;  %v91_v57 = vlaneseq }
  0x78   :  { %774 = vmatprep.subr.bf16.mxu0 %v3240_v58  ;;  %817 = vmatprep.subr.bf16.mxu1 %v3245_v59 }
  0x79   :  { %v92_v58 = vshrl.u32 %v91_v57, 7 }
  0x7b   :  { %775 = vmatpush1.bf16.msra.mxu0 %v3252_v60  ;;  %818 = vmatpush1.bf16.msra.mxu1 %v4431_v26  ;;  %v93_v56 = vsub.s32 0, %v92_v58  ;;  %v89_v60 = vld [vmem:[%s4288_s3] sm:$0xf]  ;;  %v97_v26 = vsub.s32 1, %v92_v58  ;;  %v101_v57 = vsub.s32 2, %v92_v58 }
  0x7c   :  { %776 = vmatprep.subr.bf16.mxu0 %v3264_v62  ;;  %819 = vmatprep.subr.bf16.mxu1 %v3269_v63  ;;  %v105_v62 = vsub.s32 3, %v92_v58 }
  0x7d   :  { %v3365_v59 = vrot.slane %v89_v60, %v93_v56  ;;  %v3367_v63 = vrot.slane %v89_v60, %v97_v26 }
  0x7e   :  { %v3370_v54 = vrot.slane %v89_v60, %v105_v62  ;;  %v3376_v62 = vrot.slane %v89_v60, %v101_v57 }
  0x7f   :  { %777 = vmatpush1.bf16.msra.mxu0 %v3276_v35  ;;  %820 = vmatpush1.bf16.msra.mxu1 %v3281_v1  ;;  %4432 = vst [vmem:[#allocation29_spill] sm:$0xff] %v3365_v59  ;;  %4433 = vst [vmem:[#allocation30_spill] sm:$0xff] %v3367_v63 }
  0x80   :  { %908 = vmatprep.subr.bf16.mxu0 %v2899_v0  ;;  %951 = vmatprep.subr.bf16.mxu1 %v2906_v2  ;;  %4434 = vst [vmem:[#allocation31_spill] sm:$0xff] %v3370_v54  ;;  %4435 = vst [vmem:[#allocation32_spill] sm:$0xff] %v3376_v62 }
 0x115   :  { %v562_v35 = vpop.f32.mrb[0].mxu0  ;;  %v605_v55 = vpop.f32.mrb[0].mxu1 }
 0x116   :  { %v2413_v1 = vadd.f32 %v562_v35, %v3365_v59  ;;  %v564_v0 = vpop.f32.mrb[1].mxu0  ;;  %v607_v2 = vpop.f32.mrb[1].mxu1 }
 0x117   :  { %v2414_v53 = vadd.f32 %v564_v0, %v3367_v63  ;;  %v566_v52 = vpop.f32.mrb[2].mxu0  ;;  %v609_v51 = vpop.f32.mrb[2].mxu1  ;;  %v2418_v35 = vadd.f32 %v607_v2, %v3370_v54 }
 0x118   :  { %v622_v50 = vmul.f32 0.5, %v2413_v1  ;;  %v2415_v56 = vadd.f32 %v566_v52, %v3365_v59  ;;  %v568_v49 = vpop.f32.mrb[3].mxu0  ;;  %v611_v48 = vpop.f32.mrb[3].mxu1  ;;  %v2417_v1 = vadd.f32 %v605_v55, %v3376_v62  ;;  %v2419_v52 = vadd.f32 %v609_v51, %v3376_v62 }
 0x119   :  { %v623_v26 = vmul.f32 0.5, %v2414_v53  ;;  %v2416_v47 = vadd.f32 %v568_v49, %v3367_v63  ;;  %v2420_v0 = vadd.f32 %v611_v48, %v3370_v54 }
 0x11a   :  { %2646 = vtanh.f32 %v622_v50  ;;  %v625_v46 = vmul.f32 0.5, %v2415_v56  ;;  %v624_v53 = vmul.f32 0.5, %v2417_v1  ;;  %v627_v2 = vmul.f32 0.5, %v2419_v52 }
 0x11b   :  { %v626_v45 = vmul.f32 0.5, %v2416_v47  ;;  %2648 = vtanh.f32 %v623_v26 }
 0x11c   :  { %2650 = vtanh.f32 %v625_v46 }
 0x11d   :  { %2652 = vtanh.f32 %v2418_v35 }
 0x11e   :  { %2654 = vtanh.f32 %v626_v45 }
 0x11f   :  { %2656 = vtanh.f32 %v2420_v0 }
 0x120   :  { %2658 = vtanh.f32 %v624_v53 }
 0x121   :  { %2660 = vtanh.f32 %v627_v2 }
 0x124   :  { %v2647_v49 = vpop.eup %2646 }
 0x125   :  { %v634_v50 = vmul.f32 0.5, %v2647_v49  ;;  %v2649_v58 = vpop.eup %2648 }
 0x126   :  { %v2651_v56 = vpop.eup %2650  ;;  %v635_v47 = vmul.f32 0.5, %v2649_v58 }
 0x127   :  { %v640_v60 = vadd.f32 0.5, %v634_v50  ;;  %v2653_v57 = vpop.eup %2652  ;;  %v637_v46 = vmul.f32 0.5, %v2651_v56 }
 0x128   :  { %v2655_v26 = vpop.eup %2654  ;;  %v641_v48 = vadd.f32 0.5, %v635_v47 }
 0x129   :  { %v650_v35 = vmul.f32 %v2653_v57, %v640_v60  ;;  %v643_v54 = vadd.f32 0.5, %v637_v46  ;;  %v638_v45 = vmul.f32 0.5, %v2655_v26  ;;  %v2657_v55 = vpop.eup %2656 }
 0x12a   :  { %v648_v0 = vmul.f32 0.0, %v641_v48  ;;  %v2659_v53 = vpop.eup %2658  ;;  %v4436_v48 = vld [vmem:[#allocation6_spill] sm:$0xff] }
 0x12b   :  { %v644_v51 = vadd.f32 0.5, %v638_v45  ;;  %v651_v1 = vmul.f32 %v2657_v55, %v643_v54  ;;  %v2661_v50 = vpop.eup %2660  ;;  %v636_v58 = vmul.f32 0.5, %v2659_v53  ;;  %v4437_v45 = vld [vmem:[#allocation8_spill] sm:$0xff]  ;;  %v4438_v55 = vld [vmem:[#allocation9_spill] sm:$0xff]  ;;  %v4443_v53 = vld [vmem:[#allocation14_spill] sm:$0xff] }
 0x12c   :  { %v3381_v62 = vadd.f32 %v650_v35, %v648_v0  ;;  %v639_v56 = vmul.f32 0.5, %v2661_v50  ;;  %v2640_v35 = vld [vmem:[%s4287_s0 + $0x10] sm:$0xff]   ;;  %v4444_v50 = vld [vmem:[#allocation15_spill] sm:$0xff] }
 0x12d   :  { %v649_v49 = vmul.f32 0.0, %v644_v51  ;;  %v642_v60 = vadd.f32 0.5, %v636_v58  ;;  %v4439_v0 = vld [vmem:[#allocation10_spill] sm:$0xff]  ;;  %v4440_v51 = vld [vmem:[#allocation11_spill] sm:$0xff]  ;;  %v4445_v58 = vld [vmem:[#allocation16_spill] sm:$0xff] }
 0x12e   :  { %2662 = vtanh.f32 %v3381_v62  ;;  %v645_v57 = vadd.f32 0.5, %v639_v56  ;;  %v4446_v56 = vld [vmem:[#allocation17_spill] sm:$0xff] }
 0x12f   :  { %v3384_v52 = vadd.f32 %v651_v1, %v649_v49  ;;  %v4441_v1 = vld [vmem:[#allocation12_spill] sm:$0xff]  ;;  %v4442_v49 = vld [vmem:[#allocation13_spill] sm:$0xff] }
 0x131   :  { %2664 = vtanh.f32 %v3384_v52 }
 0x138   :  { %v2663_v2 = vpop.eup %2662 }
 0x139   :  { %v656_v47 = vmul.f32 %v2663_v2, %v642_v60  ;;  %v4447_v60 = vld [vmem:[#allocation18_spill] sm:$0xff]  ;;  %v4448_v2 = vld [vmem:[#allocation19_spill] sm:$0xff] }
 0x13b   :  { %v2665_v46 = vpop.eup %2664  ;;  %662 = vst [vmem:[%s4289_s4] sm:$0xff] %v656_v47 }
 0x13c   :  { %v657_v54 = vmul.f32 %v2665_v46, %v645_v57  ;;  %v4450_v57 = vld [vmem:[#allocation21_spill] sm:$0xff]  ;;  %v4451_v46 = vld [vmem:[#allocation22_spill] sm:$0xff] }
 0x13e   :  { %v660_v26 = vpack.c.bf16 %v657_v54, %v656_v47  ;;  %663 = vst [vmem:[%s4289_s4 + $0x8] sm:$0xff] %v657_v54  ;;  %v4449_v47 = vld [vmem:[#allocation20_spill] sm:$0xff]  ;;  %v4452_v54 = vld [vmem:[#allocation23_spill] sm:$0xff] }
 0x140   :  { %795 = vmatmul.mubr.bf16.vlgmr.msra.gmra.mrb[4].mxu0 %v660_v26  ;;  %838 = vmatmul.mubr.bf16.vlgmr.msra.gmra.mrb[4].mxu1 %v660_v26  ;;  %v4453_v26 = vld [vmem:[#allocation24_spill] sm:$0xff] }
 0x141   :  { %909 = vmatpush1.bf16.msra.mxu0 %v2912_v3  ;;  %952 = vmatpush1.bf16.msra.mxu1 %v2917_v4 }
 0x142   :  { %910 = vmatprep.subr.bf16.mxu0 %v2923_v5  ;;  %953 = vmatprep.subr.bf16.mxu1 %v2930_v6 }
 0x143   :  { %940 = vmatprep.mubr.bf16.mxu0 %v4430_v61  ;;  %983 = vmatprep.mubr.bf16.mxu1 %v4430_v61 }
 0x145   :  { %911 = vmatpush1.bf16.msra.mxu0 %v2935_v7  ;;  %954 = vmatpush1.bf16.msra.mxu1 %v2941_v8 }
 0x146   :  { %912 = vmatprep.subr.bf16.mxu0 %v2947_v9  ;;  %955 = vmatprep.subr.bf16.mxu1 %v2952_v10 }
 0x149   :  { %913 = vmatpush1.bf16.msra.mxu0 %v2957_v11  ;;  %956 = vmatpush1.bf16.msra.mxu1 %v2962_v12 }
 0x14a   :  { %914 = vmatprep.subr.bf16.mxu0 %v2969_v13  ;;  %957 = vmatprep.subr.bf16.mxu1 %v2976_v14 }
 0x14d   :  { %915 = vmatpush1.bf16.msra.mxu0 %v2981_v15  ;;  %958 = vmatpush1.bf16.msra.mxu1 %v2988_v16 }
 0x14e   :  { %916 = vmatprep.subr.bf16.mxu0 %v2993_v17  ;;  %959 = vmatprep.subr.bf16.mxu1 %v3000_v18 }
 0x151   :  { %917 = vmatpush1.bf16.msra.mxu0 %v3005_v19  ;;  %960 = vmatpush1.bf16.msra.mxu1 %v3010_v20 }
 0x152   :  { %918 = vmatprep.subr.bf16.mxu0 %v3017_v21  ;;  %961 = vmatprep.subr.bf16.mxu1 %v3024_v22 }
 0x155   :  { %919 = vmatpush1.bf16.msra.mxu0 %v3029_v23  ;;  %962 = vmatpush1.bf16.msra.mxu1 %v3036_v24 }
 0x156   :  { %920 = vmatprep.subr.bf16.mxu0 %v3041_v25  ;;  %963 = vmatprep.subr.bf16.mxu1 %v4436_v48 }
 0x159   :  { %921 = vmatpush1.bf16.msra.mxu0 %v3055_v27  ;;  %964 = vmatpush1.bf16.msra.mxu1 %v3060_v28 }
 0x15a   :  { %922 = vmatprep.subr.bf16.mxu0 %v3065_v29  ;;  %965 = vmatprep.subr.bf16.mxu1 %v3072_v30 }
 0x15d   :  { %923 = vmatpush1.bf16.msra.mxu0 %v3077_v31  ;;  %966 = vmatpush1.bf16.msra.mxu1 %v3084_v32 }
 0x15e   :  { %997 = vmatprep.subr.bf16.mxu0 %v3091_v33  ;;  %1040 = vmatprep.subr.bf16.mxu1 %v3096_v34 }
 0x160   :  { %941 = vmatmul.mubr.bf16.vlgmr.msra.gmra.mrb[8].mxu0 %v2640_v35  ;;  %984 = vmatmul.mubr.bf16.vlgmr.msra.gmra.mrb[8].mxu1 %v2640_v35  ;;  %v4454_v35 = vld [vmem:[#allocation25_spill] sm:$0xff] }
 0x161   :  { %998 = vmatpush1.bf16.msra.mxu0 %v3106_v36  ;;  %1041 = vmatpush1.bf16.msra.mxu1 %v3111_v37 }
 0x162   :  { %999 = vmatprep.subr.bf16.mxu0 %v3116_v38  ;;  %1042 = vmatprep.subr.bf16.mxu1 %v3123_v39 }
 0x163   :  { %1029 = vmatprep.mubr.bf16.mxu0 %v4430_v61  ;;  %1072 = vmatprep.mubr.bf16.mxu1 %v4430_v61 }
 0x165   :  { %1000 = vmatpush1.bf16.msra.mxu0 %v3128_v40  ;;  %1043 = vmatpush1.bf16.msra.mxu1 %v3135_v41 }
 0x166   :  { %1001 = vmatprep.subr.bf16.mxu0 %v3142_v42  ;;  %1044 = vmatprep.subr.bf16.mxu1 %v3147_v43 }
 0x169   :  { %1002 = vmatpush1.bf16.msra.mxu0 %v3156_v44  ;;  %1045 = vmatpush1.bf16.msra.mxu1 %v4437_v45 }
 0x16a   :  { %1003 = vmatprep.subr.bf16.mxu0 %v4438_v55  ;;  %1046 = vmatprep.subr.bf16.mxu1 %v4439_v0 }
 0x16d   :  { %1004 = vmatpush1.bf16.msra.mxu0 %v4440_v51  ;;  %1047 = vmatpush1.bf16.msra.mxu1 %v4441_v1 }
 0x16e   :  { %1005 = vmatprep.subr.bf16.mxu0 %v4442_v49  ;;  %1048 = vmatprep.subr.bf16.mxu1 %v4443_v53 }
 0x171   :  { %1006 = vmatpush1.bf16.msra.mxu0 %v4444_v50  ;;  %1049 = vmatpush1.bf16.msra.mxu1 %v4445_v58  ;;  %v4455_v50 = vld [vmem:[#allocation26_spill] sm:$0xff]  ;;  %v4456_v58 = vld [vmem:[#allocation27_spill] sm:$0xff] }
 0x172   :  { %1007 = vmatprep.subr.bf16.mxu0 %v4446_v56  ;;  %1050 = vmatprep.subr.bf16.mxu1 %v4447_v60  ;;  %v4457_v56 = vld [vmem:[#allocation28_spill] sm:$0xff] }
 0x173   :  { %v4458_v60 = vld [vmem:[#allocation4_spill] sm:$0xff] }
 0x175   :  { %1008 = vmatpush1.bf16.msra.mxu0 %v4448_v2  ;;  %1051 = vmatpush1.bf16.msra.mxu1 %v4449_v47  ;;  %v4459_v2 = vld [vmem:[#allocation5_spill] sm:$0xff] }
 0x176   :  { %1009 = vmatprep.subr.bf16.mxu0 %v4450_v57  ;;  %1052 = vmatprep.subr.bf16.mxu1 %v4451_v46 }
 0x179   :  { %1010 = vmatpush1.bf16.msra.mxu0 %v4452_v54  ;;  %1053 = vmatpush1.bf16.msra.mxu1 %v4453_v26 }
 0x17a   :  { %1011 = vmatprep.subr.bf16.mxu0 %v4454_v35  ;;  %1054 = vmatprep.subr.bf16.mxu1 %v4455_v50 }
 0x17d   :  { %1012 = vmatpush1.bf16.msra.mxu0 %v4456_v58  ;;  %1055 = vmatpush1.bf16.msra.mxu1 %v4457_v56 }
 0x17e   :  { %1143 = vmatprep.subr.bf16.mxu0 %v4458_v60  ;;  %1186 = vmatprep.subr.bf16.mxu1 %v4459_v2  ;;  %v4460_v2 = vld [vmem:[#allocation31_spill] sm:$0xff] }
 0x213   :  { %v796_v47 = vpop.f32.mrb[4].mxu0  ;;  %v839_v57 = vpop.f32.mrb[4].mxu1 }
 0x214   :  { %v2421_v46 = vadd.f32 %v796_v47, %v3365_v59  ;;  %v798_v53 = vpop.f32.mrb[5].mxu0  ;;  %v841_v54 = vpop.f32.mrb[5].mxu1 }
 0x215   :  { %v2422_v26 = vadd.f32 %v798_v53, %v3367_v63  ;;  %v800_v49 = vpop.f32.mrb[6].mxu0  ;;  %v843_v35 = vpop.f32.mrb[6].mxu1  ;;  %v2426_v0 = vadd.f32 %v841_v54, %v4460_v2  ;;  %v4461_v53 = vld [vmem:[#allocation32_spill] sm:$0xff] }
 0x216   :  { %v856_v1 = vmul.f32 0.5, %v2421_v46  ;;  %v2423_v50 = vadd.f32 %v800_v49, %v3365_v59  ;;  %v802_v58 = vpop.f32.mrb[7].mxu0  ;;  %v845_v51 = vpop.f32.mrb[7].mxu1  ;;  %v2425_v44 = vadd.f32 %v839_v57, %v4461_v53  ;;  %v2427_v49 = vadd.f32 %v843_v35, %v4461_v53 }
 0x217   :  { %v857_v56 = vmul.f32 0.5, %v2422_v26  ;;  %v2424_v60 = vadd.f32 %v802_v58, %v3367_v63  ;;  %v2428_v47 = vadd.f32 %v845_v51, %v4460_v2 }
 0x218   :  { %2666 = vtanh.f32 %v856_v1  ;;  %v859_v55 = vmul.f32 0.5, %v2423_v50  ;;  %v858_v46 = vmul.f32 0.5, %v2425_v44  ;;  %v861_v1 = vmul.f32 0.5, %v2427_v49 }
 0x219   :  { %v860_v45 = vmul.f32 0.5, %v2424_v60  ;;  %2668 = vtanh.f32 %v857_v56 }
 0x21a   :  { %2670 = vtanh.f32 %v859_v55 }
 0x21b   :  { %2672 = vtanh.f32 %v2426_v0 }
 0x21c   :  { %2674 = vtanh.f32 %v860_v45 }
 0x21d   :  { %2676 = vtanh.f32 %v2428_v47 }
 0x21e   :  { %2678 = vtanh.f32 %v858_v46 }
 0x21f   :  { %2680 = vtanh.f32 %v861_v1 }
 0x222   :  { %v2667_v26 = vpop.eup %2666 }
 0x223   :  { %v868_v59 = vmul.f32 0.5, %v2667_v26  ;;  %v2669_v58 = vpop.eup %2668 }
 0x224   :  { %v2671_v63 = vpop.eup %2670  ;;  %v869_v50 = vmul.f32 0.5, %v2669_v58 }
 0x225   :  { %v874_v54 = vadd.f32 0.5, %v868_v59  ;;  %v2673_v56 = vpop.eup %2672  ;;  %v871_v55 = vmul.f32 0.5, %v2671_v63 }
 0x226   :  { %v2675_v60 = vpop.eup %2674  ;;  %v875_v51 = vadd.f32 0.5, %v869_v50 }
 0x227   :  { %v884_v0 = vmul.f32 %v2673_v56, %v874_v54  ;;  %v877_v2 = vadd.f32 0.5, %v871_v55  ;;  %v872_v45 = vmul.f32 0.5, %v2675_v60  ;;  %v2677_v57 = vpop.eup %2676 }
 0x228   :  { %v882_v35 = vmul.f32 %v875_v51, %v3381_v62  ;;  %v2679_v63 = vpop.eup %2678  ;;  %v4488_v51 = vld [vmem:[#allocation31_spill] sm:$0xff] }
 0x229   :  { %v878_v44 = vadd.f32 0.5, %v872_v45  ;;  %v885_v47 = vmul.f32 %v2677_v57, %v877_v2  ;;  %v2681_v46 = vpop.eup %2680  ;;  %v870_v58 = vmul.f32 0.5, %v2679_v63 }
 0x22a   :  { %v3473_v26 = vadd.f32 %v884_v0, %v882_v35  ;;  %v873_v1 = vmul.f32 0.5, %v2681_v46 }
 0x22b   :  { %v883_v49 = vmul.f32 %v878_v44, %v3384_v52  ;;  %v876_v54 = vadd.f32 0.5, %v870_v58 }
 0x22c   :  { %2682 = vtanh.f32 %v3473_v26  ;;  %v879_v62 = vadd.f32 0.5, %v873_v1 }
 0x22d   :  { %v3477_v59 = vadd.f32 %v885_v47, %v883_v49 }
 0x22f   :  { %2684 = vtanh.f32 %v3477_v59 }
 0x236   :  { %v2683_v50 = vpop.eup %2682 }
 0x237   :  { %v890_v56 = vmul.f32 %v2683_v50, %v876_v54 }
 0x239   :  { %v2685_v55 = vpop.eup %2684  ;;  %2381 = vst [vmem:[%s4289_s4 + $0x10] sm:$0xff] %v890_v56 }
 0x23a   :  { %v891_v52 = vmul.f32 %v2685_v55, %v879_v62 }
 0x23c   :  { %v894_v2 = vpack.c.bf16 %v891_v52, %v890_v56  ;;  %2382 = vst [vmem:[%s4289_s4 + $0x18] sm:$0xff] %v891_v52 }
 0x23e   :  { %1030 = vmatmul.mubr.bf16.vlgmr.msra.gmra.mrb[8].mxu0 %v894_v2  ;;  %1073 = vmatmul.mubr.bf16.vlgmr.msra.gmra.mrb[8].mxu1 %v894_v2 }
 0x23f   :  { %1144 = vmatpush1.bf16.msra.mxu0 %v2912_v3  ;;  %1187 = vmatpush1.bf16.msra.mxu1 %v2917_v4  ;;  %v2641_v3 = vld [vmem:[%s4287_s0 + $0x18] sm:$0xff]  }
 0x240   :  { %1145 = vmatprep.subr.bf16.mxu0 %v2923_v5  ;;  %1188 = vmatprep.subr.bf16.mxu1 %v2930_v6  ;;  %v4462_v4 = vld [vmem:[#allocation7_spill] sm:$0xff]  ;;  %v4463_v5 = vld [vmem:[#allocation8_spill] sm:$0xff]  ;;  %v4464_v6 = vld [vmem:[#allocation9_spill] sm:$0xff] }
 0x241   :  { %1175 = vmatprep.mubr.bf16.mxu0 %v4430_v61  ;;  %1218 = vmatprep.mubr.bf16.mxu1 %v4430_v61 }
 0x243   :  { %1146 = vmatpush1.bf16.msra.mxu0 %v2935_v7  ;;  %1189 = vmatpush1.bf16.msra.mxu1 %v2941_v8  ;;  %v4465_v7 = vld [vmem:[#allocation10_spill] sm:$0xff]  ;;  %v4466_v8 = vld [vmem:[#allocation11_spill] sm:$0xff] }
 0x244   :  { %1147 = vmatprep.subr.bf16.mxu0 %v2947_v9  ;;  %1190 = vmatprep.subr.bf16.mxu1 %v2952_v10  ;;  %v4467_v9 = vld [vmem:[#allocation12_spill] sm:$0xff]  ;;  %v4468_v10 = vld [vmem:[#allocation13_spill] sm:$0xff] }
 0x247   :  { %1148 = vmatpush1.bf16.msra.mxu0 %v2957_v11  ;;  %1191 = vmatpush1.bf16.msra.mxu1 %v2962_v12  ;;  %v4469_v11 = vld [vmem:[#allocation14_spill] sm:$0xff]  ;;  %v4470_v12 = vld [vmem:[#allocation15_spill] sm:$0xff] }
 0x248   :  { %1149 = vmatprep.subr.bf16.mxu0 %v2969_v13  ;;  %1192 = vmatprep.subr.bf16.mxu1 %v2976_v14  ;;  %v4471_v13 = vld [vmem:[#allocation16_spill] sm:$0xff]  ;;  %v4472_v14 = vld [vmem:[#allocation17_spill] sm:$0xff] }
 0x24b   :  { %1150 = vmatpush1.bf16.msra.mxu0 %v2981_v15  ;;  %1193 = vmatpush1.bf16.msra.mxu1 %v2988_v16  ;;  %v4473_v15 = vld [vmem:[#allocation18_spill] sm:$0xff]  ;;  %v4474_v16 = vld [vmem:[#allocation19_spill] sm:$0xff] }
 0x24c   :  { %1151 = vmatprep.subr.bf16.mxu0 %v2993_v17  ;;  %1194 = vmatprep.subr.bf16.mxu1 %v3000_v18  ;;  %v4475_v17 = vld [vmem:[#allocation20_spill] sm:$0xff]  ;;  %v4476_v18 = vld [vmem:[#allocation21_spill] sm:$0xff] }
 0x24f   :  { %1152 = vmatpush1.bf16.msra.mxu0 %v3005_v19  ;;  %1195 = vmatpush1.bf16.msra.mxu1 %v3010_v20  ;;  %v4477_v19 = vld [vmem:[#allocation22_spill] sm:$0xff]  ;;  %v4478_v20 = vld [vmem:[#allocation23_spill] sm:$0xff] }
 0x250   :  { %1153 = vmatprep.subr.bf16.mxu0 %v3017_v21  ;;  %1196 = vmatprep.subr.bf16.mxu1 %v3024_v22  ;;  %v4479_v21 = vld [vmem:[#allocation24_spill] sm:$0xff]  ;;  %v4480_v22 = vld [vmem:[#allocation25_spill] sm:$0xff] }
 0x253   :  { %1154 = vmatpush1.bf16.msra.mxu0 %v3029_v23  ;;  %1197 = vmatpush1.bf16.msra.mxu1 %v3036_v24  ;;  %v4481_v23 = vld [vmem:[#allocation26_spill] sm:$0xff]  ;;  %v4482_v24 = vld [vmem:[#allocation27_spill] sm:$0xff] }
 0x254   :  { %1155 = vmatprep.subr.bf16.mxu0 %v3041_v25  ;;  %1198 = vmatprep.subr.bf16.mxu1 %v4436_v48  ;;  %v4483_v25 = vld [vmem:[#allocation28_spill] sm:$0xff] }
 0x257   :  { %1156 = vmatpush1.bf16.msra.mxu0 %v3055_v27  ;;  %1199 = vmatpush1.bf16.msra.mxu1 %v3060_v28  ;;  %v3558_v27 = vld [vmem:[%s4285_s1 + $0x4] ss:$16 sps:$4 sm:$0xff]   ;;  %v3564_v28 = vld [vmem:[%s4285_s1 + $0xc] ss:$16 sps:$4 sm:$0xff]  }
 0x258   :  { %1157 = vmatprep.subr.bf16.mxu0 %v3065_v29  ;;  %1200 = vmatprep.subr.bf16.mxu1 %v3072_v30  ;;  %4484 = vst [vmem:[#allocation6_spill] sm:$0xff] %v3558_v27  ;;  %4485 = vst [vmem:[#allocation4_spill] sm:$0xff] %v3564_v28 }
 0x25b   :  { %1158 = vmatpush1.bf16.msra.mxu0 %v3077_v31  ;;  %1201 = vmatpush1.bf16.msra.mxu1 %v3084_v32  ;;  %v4486_v31 = vld [vmem:[#allocation29_spill] sm:$0xff] }
 0x25c   :  { %1232 = vmatprep.subr.bf16.mxu0 %v3091_v33  ;;  %1275 = vmatprep.subr.bf16.mxu1 %v3096_v34 }
 0x25e   :  { %1176 = vmatmul.mubr.bf16.vlgmr.msra.gmra.mrb[12].mxu0 %v2641_v3  ;;  %1219 = vmatmul.mubr.bf16.vlgmr.msra.gmra.mrb[12].mxu1 %v2641_v3 }
 0x25f   :  { %1233 = vmatpush1.bf16.msra.mxu0 %v3106_v36  ;;  %1276 = vmatpush1.bf16.msra.mxu1 %v3111_v37  ;;  %v4487_v36 = vld [vmem:[#allocation30_spill] sm:$0xff] }
 0x260   :  { %1234 = vmatprep.subr.bf16.mxu0 %v3116_v38  ;;  %1277 = vmatprep.subr.bf16.mxu1 %v3123_v39 }
 0x261   :  { %1264 = vmatprep.mubr.bf16.mxu0 %v4430_v61  ;;  %1307 = vmatprep.mubr.bf16.mxu1 %v4430_v61 }
 0x263   :  { %1235 = vmatpush1.bf16.msra.mxu0 %v3128_v40  ;;  %1278 = vmatpush1.bf16.msra.mxu1 %v3135_v41 }
 0x264   :  { %1236 = vmatprep.subr.bf16.mxu0 %v3142_v42  ;;  %1279 = vmatprep.subr.bf16.mxu1 %v3147_v43 }
 0x267   :  { %1237 = vmatpush1.bf16.msra.mxu0 %v4462_v4  ;;  %1280 = vmatpush1.bf16.msra.mxu1 %v4463_v5 }
 0x268   :  { %1238 = vmatprep.subr.bf16.mxu0 %v4464_v6  ;;  %1281 = vmatprep.subr.bf16.mxu1 %v4465_v7 }
 0x26b   :  { %1239 = vmatpush1.bf16.msra.mxu0 %v4466_v8  ;;  %1282 = vmatpush1.bf16.msra.mxu1 %v4467_v9 }
 0x26c   :  { %1240 = vmatprep.subr.bf16.mxu0 %v4468_v10  ;;  %1283 = vmatprep.subr.bf16.mxu1 %v4469_v11 }
 0x26f   :  { %1241 = vmatpush1.bf16.msra.mxu0 %v4470_v12  ;;  %1284 = vmatpush1.bf16.msra.mxu1 %v4471_v13 }
 0x270   :  { %1242 = vmatprep.subr.bf16.mxu0 %v4472_v14  ;;  %1285 = vmatprep.subr.bf16.mxu1 %v4473_v15 }
 0x273   :  { %1243 = vmatpush1.bf16.msra.mxu0 %v4474_v16  ;;  %1286 = vmatpush1.bf16.msra.mxu1 %v4475_v17 }
 0x274   :  { %1244 = vmatprep.subr.bf16.mxu0 %v4476_v18  ;;  %1287 = vmatprep.subr.bf16.mxu1 %v4477_v19 }
 0x277   :  { %1245 = vmatpush1.bf16.msra.mxu0 %v4478_v20  ;;  %1288 = vmatpush1.bf16.msra.mxu1 %v4479_v21 }
 0x278   :  { %1246 = vmatprep.subr.bf16.mxu0 %v4480_v22  ;;  %1289 = vmatprep.subr.bf16.mxu1 %v4481_v23 }
 0x27b   :  { %1247 = vmatpush1.bf16.msra.mxu0 %v4482_v24  ;;  %1290 = vmatpush1.bf16.msra.mxu1 %v4483_v25 }
 0x27c   :  { %1378 = vmatprep.subr.bf16.mxu0 %v3558_v27  ;;  %1421 = vmatprep.subr.bf16.mxu1 %v3564_v28 }
 0x311   :  { %v1031_v29 = vpop.f32.mrb[8].mxu0  ;;  %v1074_v30 = vpop.f32.mrb[8].mxu1 }
 0x312   :  { %v2429_v32 = vadd.f32 %v1031_v29, %v4486_v31  ;;  %v1033_v33 = vpop.f32.mrb[9].mxu0  ;;  %v1076_v34 = vpop.f32.mrb[9].mxu1  ;;  %v2433_v44 = vadd.f32 %v1074_v30, %v4461_v53 }
 0x313   :  { %v2430_v37 = vadd.f32 %v1033_v33, %v4487_v36  ;;  %v1035_v38 = vpop.f32.mrb[10].mxu0  ;;  %v1078_v39 = vpop.f32.mrb[10].mxu1  ;;  %v2434_v0 = vadd.f32 %v1076_v34, %v4488_v51  ;;  %v3592_v34 = vld [vmem:[%s4285_s1] ss:$16 sps:$4 sm:$0xff]  }
 0x314   :  { %v1091_v40 = vmul.f32 0.5, %v2429_v32  ;;  %v2431_v41 = vadd.f32 %v1035_v38, %v4486_v31  ;;  %v1037_v42 = vpop.f32.mrb[11].mxu0  ;;  %v1080_v43 = vpop.f32.mrb[11].mxu1  ;;  %v2435_v47 = vadd.f32 %v1078_v39, %v4461_v53  ;;  %v1093_v49 = vmul.f32 0.5, %v2433_v44  ;;  %v3604_v38 = vld [vmem:[%s4285_s1 + $0x24] ss:$16 sps:$4 sm:$0xff]  }
 0x315   :  { %v1092_v48 = vmul.f32 0.5, %v2430_v37  ;;  %v2432_v60 = vadd.f32 %v1037_v42, %v4487_v36  ;;  %v2436_v35 = vadd.f32 %v1080_v43, %v4488_v51  ;;  %v3598_v37 = vld [vmem:[%s4285_s1 + $0x8] ss:$16 sps:$4 sm:$0xff]   ;;  %v3610_v39 = vld [vmem:[%s4285_s1 + $0x2c] ss:$16 sps:$4 sm:$0xff]  }
 0x316   :  { %2686 = vtanh.f32 %v1091_v40  ;;  %v1094_v45 = vmul.f32 0.5, %v2431_v41  ;;  %v1096_v1 = vmul.f32 0.5, %v2435_v47  ;;  %v3618_v40 = vld [vmem:[%s4285_s1 + $0x20] ss:$16 sps:$4 sm:$0xff]   ;;  %v3624_v41 = vld [vmem:[%s4285_s1 + $0x28] ss:$16 sps:$4 sm:$0xff]  }
 0x317   :  { %v1095_v57 = vmul.f32 0.5, %v2432_v60  ;;  %2688 = vtanh.f32 %v1092_v48  ;;  %v3630_v42 = vld [vmem:[%s4285_s1 + $0x44] ss:$16 sps:$4 sm:$0xff]   ;;  %v3636_v43 = vld [vmem:[%s4285_s1 + $0x4c] ss:$16 sps:$4 sm:$0xff]  }
 0x318   :  { %2690 = vtanh.f32 %v1094_v45  ;;  %v3642_v48 = vld [vmem:[%s4285_s1 + $0x40] ss:$16 sps:$4 sm:$0xff]   ;;  %v3648_v60 = vld [vmem:[%s4285_s1 + $0x48] ss:$16 sps:$4 sm:$0xff]   ;;  %v3660_v45 = vld [vmem:[%s4285_s1 + $0x6c] ss:$16 sps:$4 sm:$0xff]  }
 0x319   :  { %2692 = vtanh.f32 %v2434_v0  ;;  %v3654_v0 = vld [vmem:[%s4285_s1 + $0x64] ss:$16 sps:$4 sm:$0xff]   ;;  %v3684_v47 = vld [vmem:[%s4285_s1 + $0x8c] ss:$16 sps:$4 sm:$0xff]  }
 0x31a   :  { %2694 = vtanh.f32 %v1095_v57  ;;  %v3666_v57 = vld [vmem:[%s4285_s1 + $0x60] ss:$16 sps:$4 sm:$0xff]   ;;  %v3678_v44 = vld [vmem:[%s4285_s1 + $0x84] ss:$16 sps:$4 sm:$0xff]  }
 0x31b   :  { %2696 = vtanh.f32 %v2436_v35  ;;  %v3672_v35 = vld [vmem:[%s4285_s1 + $0x68] ss:$16 sps:$4 sm:$0xff]  }
 0x31c   :  { %2698 = vtanh.f32 %v1093_v49  ;;  %v3690_v49 = vld [vmem:[%s4285_s1 + $0x80] ss:$16 sps:$4 sm:$0xff]  }
 0x31d   :  { %2700 = vtanh.f32 %v1096_v1  ;;  %v3714_v1 = vld [vmem:[%s4285_s1 + $0xa0] ss:$16 sps:$4 sm:$0xff]  }
 0x320   :  { %v2687_v63 = vpop.eup %2686 }
 0x321   :  { %v1103_v46 = vmul.f32 0.5, %v2687_v63  ;;  %v2689_v58 = vpop.eup %2688  ;;  %v3696_v63 = vld [vmem:[%s4285_s1 + $0x88] ss:$16 sps:$4 sm:$0xff]  }
 0x322   :  { %v2691_v54 = vpop.eup %2690  ;;  %v1104_v56 = vmul.f32 0.5, %v2689_v58  ;;  %v3708_v58 = vld [vmem:[%s4285_s1 + $0xac] ss:$16 sps:$4 sm:$0xff]  }
 0x323   :  { %v1109_v50 = vadd.f32 0.5, %v1103_v46  ;;  %v2693_v62 = vpop.eup %2692  ;;  %v1106_v55 = vmul.f32 0.5, %v2691_v54  ;;  %v3702_v46 = vld [vmem:[%s4285_s1 + $0xa4] ss:$16 sps:$4 sm:$0xff]   ;;  %v3720_v54 = vld [vmem:[%s4285_s1 + $0xa8] ss:$16 sps:$4 sm:$0xff]  }
 0x324   :  { %v2695_v52 = vpop.eup %2694  ;;  %v1110_v2 = vadd.f32 0.5, %v1104_v56  ;;  %v3732_v56 = vld [vmem:[%s4285_s1 + $0xcc] ss:$16 sps:$4 sm:$0xff]  }
 0x325   :  { %v1119_v3 = vmul.f32 %v2693_v62, %v1109_v50  ;;  %v1112_v4 = vadd.f32 0.5, %v1106_v55  ;;  %v1107_v5 = vmul.f32 0.5, %v2695_v52  ;;  %v2697_v6 = vpop.eup %2696  ;;  %v3726_v50 = vld [vmem:[%s4285_s1 + $0xc4] ss:$16 sps:$4 sm:$0xff]   ;;  %v3738_v62 = vld [vmem:[%s4285_s1 + $0xc0] ss:$16 sps:$4 sm:$0xff]  }
 0x326   :  { %v1117_v7 = vmul.f32 %v1110_v2, %v3473_v26  ;;  %v2699_v13 = vpop.eup %2698  ;;  %v3744_v55 = vld [vmem:[%s4285_s1 + $0xc8] ss:$16 sps:$4 sm:$0xff]   ;;  %v3750_v52 = vld [vmem:[%s4285_s1 + $0xe4] ss:$16 sps:$4 sm:$0xff]   ;;  %v3756_v2 = vld [vmem:[%s4285_s1 + $0xec] ss:$16 sps:$4 sm:$0xff]  }
 0x327   :  { %v1113_v8 = vadd.f32 0.5, %v1107_v5  ;;  %v1120_v9 = vmul.f32 %v2697_v6, %v1112_v4  ;;  %v2701_v14 = vpop.eup %2700  ;;  %v1105_v15 = vmul.f32 0.5, %v2699_v13  ;;  %v3768_v4 = vld [vmem:[%s4285_s1 + $0xe8] ss:$16 sps:$4 sm:$0xff]   ;;  %v3774_v5 = vld [vmem:[%s4286_s2 + $0x4] ss:$16 sps:$4 sm:$0xff]  }
 0x328   :  { %v3576_v10 = vadd.f32 %v1119_v3, %v1117_v7  ;;  %v1108_v16 = vmul.f32 0.5, %v2701_v14  ;;  %v3762_v3 = vld [vmem:[%s4285_s1 + $0xe0] ss:$16 sps:$4 sm:$0xff]   ;;  %v3780_v6 = vld [vmem:[%s4286_s2 + $0xc] ss:$16 sps:$4 sm:$0xff]  }
 0x329   :  { %v1118_v11 = vmul.f32 %v1113_v8, %v3477_v59  ;;  %v1111_v17 = vadd.f32 0.5, %v1105_v15  ;;  %v2642_v7 = vld [vmem:[%s4287_s0 + $0x20] sm:$0xff]   ;;  %v3807_v13 = vld [vmem:[%s4286_s2 + $0x2c] ss:$16 sps:$4 sm:$0xff]   ;;  %v3821_v15 = vld [vmem:[%s4286_s2 + $0x28] ss:$16 sps:$4 sm:$0xff]  }
 0x32a   :  { %2702 = vtanh.f32 %v3576_v10  ;;  %v1114_v26 = vadd.f32 0.5, %v1108_v16  ;;  %v3789_v8 = vld [vmem:[%s4286_s2] ss:$16 sps:$4 sm:$0xff]   ;;  %v3827_v16 = vld [vmem:[%s4286_s2 + $0x44] ss:$16 sps:$4 sm:$0xff]  }
 0x32b   :  { %v3580_v12 = vadd.f32 %v1120_v9, %v1118_v11  ;;  %v3795_v9 = vld [vmem:[%s4286_s2 + $0x8] ss:$16 sps:$4 sm:$0xff]   ;;  %v3801_v11 = vld [vmem:[%s4286_s2 + $0x24] ss:$16 sps:$4 sm:$0xff]   ;;  %v3815_v14 = vld [vmem:[%s4286_s2 + $0x20] ss:$16 sps:$4 sm:$0xff]  }
 0x32d   :  { %2704 = vtanh.f32 %v3580_v12 }
 0x334   :  { %v2703_v29 = vpop.eup %2702 }
 0x335   :  { %v1125_v30 = vmul.f32 %v2703_v29, %v1111_v17  ;;  %v3833_v17 = vld [vmem:[%s4286_s2 + $0x4c] ss:$16 sps:$4 sm:$0xff]   ;;  %v3839_v29 = vld [vmem:[%s4286_s2 + $0x40] ss:$16 sps:$4 sm:$0xff]  }
 0x336   :  { %4489 = vst [vmem:[#allocation5_spill] sm:$0xff] %v3839_v29 }
 0x337   :  { %v2705_v32 = vpop.eup %2704  ;;  %2386 = vst [vmem:[%s4289_s4 + $0x20] sm:$0xff] %v1125_v30 }
 0x338   :  { %v1126_v59 = vmul.f32 %v2705_v32, %v1114_v26  ;;  %v3851_v26 = vld [vmem:[%s4286_s2 + $0x64] ss:$16 sps:$4 sm:$0xff]   ;;  %v3857_v32 = vld [vmem:[%s4286_s2 + $0x6c] ss:$16 sps:$4 sm:$0xff]  }
 0x339   :  { %4491 = vst [vmem:[#allocation7_spill] sm:$0xff] %v3851_v26  ;;  %4492 = vst [vmem:[#allocation8_spill] sm:$0xff] %v3857_v32 }
 0x33a   :  { %v1129_v33 = vpack.c.bf16 %v1126_v59, %v1125_v30  ;;  %2387 = vst [vmem:[%s4289_s4 + $0x28] sm:$0xff] %v1126_v59  ;;  %v3845_v30 = vld [vmem:[%s4286_s2 + $0x48] ss:$16 sps:$4 sm:$0xff]   ;;  %v3863_v59 = vld [vmem:[%s4286_s2 + $0x60] ss:$16 sps:$4 sm:$0xff]  }
 0x33b   :  { %4490 = vst [vmem:[#allocation32_spill] sm:$0xff] %v3845_v30  ;;  %4493 = vst [vmem:[#allocation9_spill] sm:$0xff] %v3863_v59 }
 0x33c   :  { %1265 = vmatmul.mubr.bf16.vlgmr.msra.gmra.mrb[12].mxu0 %v1129_v33  ;;  %1308 = vmatmul.mubr.bf16.vlgmr.msra.gmra.mrb[12].mxu1 %v1129_v33  ;;  %v3869_v33 = vld [vmem:[%s4286_s2 + $0x68] ss:$16 sps:$4 sm:$0xff]  }
 0x33d   :  { %1379 = vmatpush1.bf16.msra.mxu0 %v3592_v34  ;;  %1422 = vmatpush1.bf16.msra.mxu1 %v3598_v37  ;;  %4494 = vst [vmem:[#allocation10_spill] sm:$0xff] %v3869_v33 }
 0x33e   :  { %1380 = vmatprep.subr.bf16.mxu0 %v3604_v38  ;;  %1423 = vmatprep.subr.bf16.mxu1 %v3610_v39 }
 0x33f   :  { %1410 = vmatprep.mubr.bf16.mxu0 %v4430_v61  ;;  %1453 = vmatprep.mubr.bf16.mxu1 %v4430_v61 }
 0x341   :  { %1381 = vmatpush1.bf16.msra.mxu0 %v3618_v40  ;;  %1424 = vmatpush1.bf16.msra.mxu1 %v3624_v41 }
 0x342   :  { %1382 = vmatprep.subr.bf16.mxu0 %v3630_v42  ;;  %1425 = vmatprep.subr.bf16.mxu1 %v3636_v43 }
 0x345   :  { %1383 = vmatpush1.bf16.msra.mxu0 %v3642_v48  ;;  %1426 = vmatpush1.bf16.msra.mxu1 %v3648_v60 }
 0x346   :  { %1384 = vmatprep.subr.bf16.mxu0 %v3654_v0  ;;  %1427 = vmatprep.subr.bf16.mxu1 %v3660_v45 }
 0x349   :  { %1385 = vmatpush1.bf16.msra.mxu0 %v3666_v57  ;;  %1428 = vmatpush1.bf16.msra.mxu1 %v3672_v35 }
 0x34a   :  { %1386 = vmatprep.subr.bf16.mxu0 %v3678_v44  ;;  %1429 = vmatprep.subr.bf16.mxu1 %v3684_v47 }
 0x34d   :  { %1387 = vmatpush1.bf16.msra.mxu0 %v3690_v49  ;;  %1430 = vmatpush1.bf16.msra.mxu1 %v3696_v63 }
 0x34e   :  { %1388 = vmatprep.subr.bf16.mxu0 %v3702_v46  ;;  %1431 = vmatprep.subr.bf16.mxu1 %v3708_v58 }
 0x351   :  { %1389 = vmatpush1.bf16.msra.mxu0 %v3714_v1  ;;  %1432 = vmatpush1.bf16.msra.mxu1 %v3720_v54 }
 0x352   :  { %1390 = vmatprep.subr.bf16.mxu0 %v3726_v50  ;;  %1433 = vmatprep.subr.bf16.mxu1 %v3732_v56 }
 0x355   :  { %1391 = vmatpush1.bf16.msra.mxu0 %v3738_v62  ;;  %1434 = vmatpush1.bf16.msra.mxu1 %v3744_v55 }
 0x356   :  { %1392 = vmatprep.subr.bf16.mxu0 %v3750_v52  ;;  %1435 = vmatprep.subr.bf16.mxu1 %v3756_v2 }
 0x359   :  { %1393 = vmatpush1.bf16.msra.mxu0 %v3762_v3  ;;  %1436 = vmatpush1.bf16.msra.mxu1 %v3768_v4 }
 0x35a   :  { %1467 = vmatprep.subr.bf16.mxu0 %v3774_v5  ;;  %1510 = vmatprep.subr.bf16.mxu1 %v3780_v6 }
 0x35c   :  { %1411 = vmatmul.mubr.bf16.vlgmr.msra.gmra.mrb[16].mxu0 %v2642_v7  ;;  %1454 = vmatmul.mubr.bf16.vlgmr.msra.gmra.mrb[16].mxu1 %v2642_v7  ;;  %v3875_v7 = vld [vmem:[%s4286_s2 + $0x84] ss:$16 sps:$4 sm:$0xff]  }
 0x35d   :  { %1468 = vmatpush1.bf16.msra.mxu0 %v3789_v8  ;;  %1511 = vmatpush1.bf16.msra.mxu1 %v3795_v9  ;;  %4495 = vst [vmem:[#allocation11_spill] sm:$0xff] %v3875_v7 }
 0x35e   :  { %1469 = vmatprep.subr.bf16.mxu0 %v3801_v11  ;;  %1512 = vmatprep.subr.bf16.mxu1 %v3807_v13 }
 0x35f   :  { %1499 = vmatprep.mubr.bf16.mxu0 %v4430_v61  ;;  %1542 = vmatprep.mubr.bf16.mxu1 %v4430_v61 }
 0x361   :  { %1470 = vmatpush1.bf16.msra.mxu0 %v3815_v14  ;;  %1513 = vmatpush1.bf16.msra.mxu1 %v3821_v15 }
 0x362   :  { %1471 = vmatprep.subr.bf16.mxu0 %v3827_v16  ;;  %1514 = vmatprep.subr.bf16.mxu1 %v3833_v17 }
 0x365   :  { %1472 = vmatpush1.bf16.msra.mxu0 %v3839_v29  ;;  %1515 = vmatpush1.bf16.msra.mxu1 %v3845_v30 }
 0x366   :  { %1473 = vmatprep.subr.bf16.mxu0 %v3851_v26  ;;  %1516 = vmatprep.subr.bf16.mxu1 %v3857_v32  ;;  %v3881_v32 = vld [vmem:[%s4286_s2 + $0x8c] ss:$16 sps:$4 sm:$0xff]  }
 0x367   :  { %4496 = vst [vmem:[#allocation12_spill] sm:$0xff] %v3881_v32 }
 0x369   :  { %1474 = vmatpush1.bf16.msra.mxu0 %v3863_v59  ;;  %1517 = vmatpush1.bf16.msra.mxu1 %v3869_v33  ;;  %v3887_v59 = vld [vmem:[%s4286_s2 + $0x80] ss:$16 sps:$4 sm:$0xff]   ;;  %v3893_v33 = vld [vmem:[%s4286_s2 + $0x88] ss:$16 sps:$4 sm:$0xff]  }
 0x36a   :  { %1475 = vmatprep.subr.bf16.mxu0 %v3875_v7  ;;  %1518 = vmatprep.subr.bf16.mxu1 %v3881_v32  ;;  %4497 = vst [vmem:[#allocation13_spill] sm:$0xff] %v3887_v59  ;;  %4498 = vst [vmem:[#allocation14_spill] sm:$0xff] %v3893_v33  ;;  %v3899_v7 = vld [vmem:[%s4286_s2 + $0xa4] ss:$16 sps:$4 sm:$0xff]   ;;  %v3905_v32 = vld [vmem:[%s4286_s2 + $0xac] ss:$16 sps:$4 sm:$0xff]  }
 0x36b   :  { %4499 = vst [vmem:[#allocation15_spill] sm:$0xff] %v3899_v7  ;;  %4500 = vst [vmem:[#allocation16_spill] sm:$0xff] %v3905_v32 }
 0x36d   :  { %1476 = vmatpush1.bf16.msra.mxu0 %v3887_v59  ;;  %1519 = vmatpush1.bf16.msra.mxu1 %v3893_v33  ;;  %v3911_v59 = vld [vmem:[%s4286_s2 + $0xa0] ss:$16 sps:$4 sm:$0xff]   ;;  %v3917_v33 = vld [vmem:[%s4286_s2 + $0xa8] ss:$16 sps:$4 sm:$0xff]  }
 0x36e   :  { %1477 = vmatprep.subr.bf16.mxu0 %v3899_v7  ;;  %1520 = vmatprep.subr.bf16.mxu1 %v3905_v32  ;;  %4501 = vst [vmem:[#allocation17_spill] sm:$0xff] %v3911_v59  ;;  %4502 = vst [vmem:[#allocation18_spill] sm:$0xff] %v3917_v33 }
 0x371   :  { %1478 = vmatpush1.bf16.msra.mxu0 %v3911_v59  ;;  %1521 = vmatpush1.bf16.msra.mxu1 %v3917_v33 }
 0x372   :  { %1479 = vmatprep.subr.bf16.mxu0 %v4476_v18  ;;  %1522 = vmatprep.subr.bf16.mxu1 %v4477_v19 }
 0x375   :  { %1480 = vmatpush1.bf16.msra.mxu0 %v4478_v20  ;;  %1523 = vmatpush1.bf16.msra.mxu1 %v4479_v21 }
 0x376   :  { %1481 = vmatprep.subr.bf16.mxu0 %v4480_v22  ;;  %1524 = vmatprep.subr.bf16.mxu1 %v4481_v23 }
 0x379   :  { %1482 = vmatpush1.bf16.msra.mxu0 %v4482_v24  ;;  %1525 = vmatpush1.bf16.msra.mxu1 %v4483_v25 }
 0x37a   :  { %1613 = vmatprep.subr.bf16.mxu0 %v3558_v27  ;;  %1656 = vmatprep.subr.bf16.mxu1 %v3564_v28 }
 0x40f   :  { %v1266_v33 = vpop.f32.mrb[12].mxu0  ;;  %v1309_v18 = vpop.f32.mrb[12].mxu1 }
 0x410   :  { %v2437_v19 = vadd.f32 %v1266_v33, %v4486_v31  ;;  %v1268_v59 = vpop.f32.mrb[13].mxu0  ;;  %v1311_v20 = vpop.f32.mrb[13].mxu1 }
 0x411   :  { %v2438_v21 = vadd.f32 %v1268_v59, %v4487_v36  ;;  %v1270_v32 = vpop.f32.mrb[14].mxu0  ;;  %v1313_v22 = vpop.f32.mrb[14].mxu1  ;;  %v2442_v28 = vadd.f32 %v1311_v20, %v4488_v51  ;;  %v2441_v59 = vadd.f32 %v1309_v18, %v4461_v53 }
 0x412   :  { %v1326_v7 = vmul.f32 0.5, %v2437_v19  ;;  %v2439_v23 = vadd.f32 %v1270_v32, %v4486_v31  ;;  %v1272_v24 = vpop.f32.mrb[15].mxu0  ;;  %v1315_v26 = vpop.f32.mrb[15].mxu1  ;;  %v2443_v32 = vadd.f32 %v1313_v22, %v4461_v53 }
 0x413   :  { %v1327_v25 = vmul.f32 0.5, %v2438_v21  ;;  %v2440_v27 = vadd.f32 %v1272_v24, %v4487_v36  ;;  %v2444_v33 = vadd.f32 %v1315_v26, %v4488_v51  ;;  %v1328_v19 = vmul.f32 0.5, %v2441_v59 }
 0x414   :  { %2706 = vtanh.f32 %v1326_v7  ;;  %v1329_v30 = vmul.f32 0.5, %v2439_v23  ;;  %v1331_v7 = vmul.f32 0.5, %v2443_v32 }
 0x415   :  { %v1330_v29 = vmul.f32 0.5, %v2440_v27  ;;  %2708 = vtanh.f32 %v1327_v25 }
 0x416   :  { %2710 = vtanh.f32 %v1329_v30 }
 0x417   :  { %2712 = vtanh.f32 %v2442_v28 }
 0x418   :  { %2714 = vtanh.f32 %v1330_v29 }
 0x419   :  { %2716 = vtanh.f32 %v2444_v33 }
 0x41a   :  { %2718 = vtanh.f32 %v1328_v19 }
 0x41b   :  { %2720 = vtanh.f32 %v1331_v7 }
 0x41e   :  { %v2707_v21 = vpop.eup %2706 }
 0x41f   :  { %v1338_v31 = vmul.f32 0.5, %v2707_v21  ;;  %v2709_v24 = vpop.eup %2708 }
 0x420   :  { %v2711_v36 = vpop.eup %2710  ;;  %v1339_v27 = vmul.f32 0.5, %v2709_v24 }
 0x421   :  { %v1344_v20 = vadd.f32 0.5, %v1338_v31  ;;  %v2713_v23 = vpop.eup %2712  ;;  %v1341_v30 = vmul.f32 0.5, %v2711_v36 }
 0x422   :  { %v2715_v25 = vpop.eup %2714  ;;  %v1345_v26 = vadd.f32 0.5, %v1339_v27 }
 0x423   :  { %v1354_v28 = vmul.f32 %v2713_v23, %v1344_v20  ;;  %v1347_v51 = vadd.f32 0.5, %v1341_v30  ;;  %v1342_v29 = vmul.f32 0.5, %v2715_v25  ;;  %v2717_v18 = vpop.eup %2716  ;;  %v2643_v25 = vld [vmem:[%s4287_s0 + $0x28] sm:$0xff]  }
 0x424   :  { %v1352_v22 = vmul.f32 %v1345_v26, %v3576_v10  ;;  %v2719_v36 = vpop.eup %2718  ;;  %v4503_v26 = vld [vmem:[#allocation5_spill] sm:$0xff] }
 0x425   :  { %v1348_v33 = vadd.f32 0.5, %v1342_v29  ;;  %v1355_v59 = vmul.f32 %v2717_v18, %v1347_v51  ;;  %v2721_v19 = vpop.eup %2720  ;;  %v1340_v24 = vmul.f32 0.5, %v2719_v36  ;;  %v4505_v29 = vld [vmem:[#allocation7_spill] sm:$0xff]  ;;  %v4506_v18 = vld [vmem:[#allocation8_spill] sm:$0xff]  ;;  %v4511_v36 = vld [vmem:[#allocation13_spill] sm:$0xff] }
 0x426   :  { %v3939_v21 = vadd.f32 %v1354_v28, %v1352_v22  ;;  %v1343_v7 = vmul.f32 0.5, %v2721_v19  ;;  %v4504_v28 = vld [vmem:[#allocation32_spill] sm:$0xff]  ;;  %v4507_v22 = vld [vmem:[#allocation9_spill] sm:$0xff]  ;;  %v4512_v19 = vld [vmem:[#allocation14_spill] sm:$0xff] }
 0x427   :  { %v1353_v32 = vmul.f32 %v1348_v33, %v3580_v12  ;;  %v1346_v20 = vadd.f32 0.5, %v1340_v24  ;;  %v4508_v33 = vld [vmem:[#allocation10_spill] sm:$0xff]  ;;  %v4513_v24 = vld [vmem:[#allocation15_spill] sm:$0xff] }
 0x428   :  { %2722 = vtanh.f32 %v3939_v21  ;;  %v1349_v10 = vadd.f32 0.5, %v1343_v7  ;;  %v4514_v7 = vld [vmem:[#allocation16_spill] sm:$0xff] }
 0x429   :  { %v3943_v31 = vadd.f32 %v1355_v59, %v1353_v32  ;;  %v4509_v59 = vld [vmem:[#allocation11_spill] sm:$0xff]  ;;  %v4510_v32 = vld [vmem:[#allocation12_spill] sm:$0xff] }
 0x42b   :  { %2724 = vtanh.f32 %v3943_v31 }
 0x432   :  { %v2723_v27 = vpop.eup %2722 }
 0x433   :  { %v1360_v23 = vmul.f32 %v2723_v27, %v1346_v20  ;;  %v4515_v20 = vld [vmem:[#allocation17_spill] sm:$0xff]  ;;  %v4516_v27 = vld [vmem:[#allocation18_spill] sm:$0xff] }
 0x435   :  { %v2725_v30 = vpop.eup %2724  ;;  %2391 = vst [vmem:[%s4289_s4 + $0x30] sm:$0xff] %v1360_v23 }
 0x436   :  { %v1361_v51 = vmul.f32 %v2725_v30, %v1349_v10  ;;  %v4022_v10 = vld [vmem:[%s4286_s2 + $0xcc] ss:$16 sps:$4 sm:$0xff]   ;;  %v4028_v30 = vld [vmem:[%s4286_s2 + $0xc0] ss:$16 sps:$4 sm:$0xff]  }
 0x437   :  { %4518 = vst [vmem:[#allocation20_spill] sm:$0xff] %v4022_v10  ;;  %4519 = vst [vmem:[#allocation21_spill] sm:$0xff] %v4028_v30 }
 0x438   :  { %v1364_v12 = vpack.c.bf16 %v1361_v51, %v1360_v23  ;;  %2392 = vst [vmem:[%s4289_s4 + $0x38] sm:$0xff] %v1361_v51  ;;  %v4016_v23 = vld [vmem:[%s4286_s2 + $0xc4] ss:$16 sps:$4 sm:$0xff]   ;;  %v4034_v51 = vld [vmem:[%s4286_s2 + $0xc8] ss:$16 sps:$4 sm:$0xff]  }
 0x439   :  { %4517 = vst [vmem:[#allocation19_spill] sm:$0xff] %v4016_v23  ;;  %4520 = vst [vmem:[#allocation22_spill] sm:$0xff] %v4034_v51 }
 0x43a   :  { %1500 = vmatmul.mubr.bf16.vlgmr.msra.gmra.mrb[16].mxu0 %v1364_v12  ;;  %1543 = vmatmul.mubr.bf16.vlgmr.msra.gmra.mrb[16].mxu1 %v1364_v12  ;;  %v4040_v12 = vld [vmem:[%s4286_s2 + $0xe4] ss:$16 sps:$4 sm:$0xff]  }
 0x43b   :  { %1614 = vmatpush1.bf16.msra.mxu0 %v3592_v34  ;;  %1657 = vmatpush1.bf16.msra.mxu1 %v3598_v37  ;;  %4521 = vst [vmem:[#allocation23_spill] sm:$0xff] %v4040_v12 }
 0x43c   :  { %1615 = vmatprep.subr.bf16.mxu0 %v3604_v38  ;;  %1658 = vmatprep.subr.bf16.mxu1 %v3610_v39 }
 0x43d   :  { %1645 = vmatprep.mubr.bf16.mxu0 %v4430_v61  ;;  %1688 = vmatprep.mubr.bf16.mxu1 %v4430_v61 }
 0x43f   :  { %1616 = vmatpush1.bf16.msra.mxu0 %v3618_v40  ;;  %1659 = vmatpush1.bf16.msra.mxu1 %v3624_v41 }
 0x440   :  { %1617 = vmatprep.subr.bf16.mxu0 %v3630_v42  ;;  %1660 = vmatprep.subr.bf16.mxu1 %v3636_v43 }
 0x443   :  { %1618 = vmatpush1.bf16.msra.mxu0 %v3642_v48  ;;  %1661 = vmatpush1.bf16.msra.mxu1 %v3648_v60 }
 0x444   :  { %1619 = vmatprep.subr.bf16.mxu0 %v3654_v0  ;;  %1662 = vmatprep.subr.bf16.mxu1 %v3660_v45 }
 0x447   :  { %1620 = vmatpush1.bf16.msra.mxu0 %v3666_v57  ;;  %1663 = vmatpush1.bf16.msra.mxu1 %v3672_v35 }
 0x448   :  { %1621 = vmatprep.subr.bf16.mxu0 %v3678_v44  ;;  %1664 = vmatprep.subr.bf16.mxu1 %v3684_v47 }
 0x44b   :  { %1622 = vmatpush1.bf16.msra.mxu0 %v3690_v49  ;;  %1665 = vmatpush1.bf16.msra.mxu1 %v3696_v63 }
 0x44c   :  { %1623 = vmatprep.subr.bf16.mxu0 %v3702_v46  ;;  %1666 = vmatprep.subr.bf16.mxu1 %v3708_v58 }
 0x44f   :  { %1624 = vmatpush1.bf16.msra.mxu0 %v3714_v1  ;;  %1667 = vmatpush1.bf16.msra.mxu1 %v3720_v54 }
 0x450   :  { %1625 = vmatprep.subr.bf16.mxu0 %v3726_v50  ;;  %1668 = vmatprep.subr.bf16.mxu1 %v3732_v56 }
 0x453   :  { %1626 = vmatpush1.bf16.msra.mxu0 %v3738_v62  ;;  %1669 = vmatpush1.bf16.msra.mxu1 %v3744_v55 }
 0x454   :  { %1627 = vmatprep.subr.bf16.mxu0 %v3750_v52  ;;  %1670 = vmatprep.subr.bf16.mxu1 %v3756_v2 }
 0x457   :  { %1628 = vmatpush1.bf16.msra.mxu0 %v3762_v3  ;;  %1671 = vmatpush1.bf16.msra.mxu1 %v3768_v4 }
 0x458   :  { %1702 = vmatprep.subr.bf16.mxu0 %v3774_v5  ;;  %1745 = vmatprep.subr.bf16.mxu1 %v3780_v6 }
 0x45a   :  { %1646 = vmatmul.mubr.bf16.vlgmr.msra.gmra.mrb[20].mxu0 %v2643_v25  ;;  %1689 = vmatmul.mubr.bf16.vlgmr.msra.gmra.mrb[20].mxu1 %v2643_v25  ;;  %v4046_v25 = vld [vmem:[%s4286_s2 + $0xec] ss:$16 sps:$4 sm:$0xff]  }
 0x45b   :  { %1703 = vmatpush1.bf16.msra.mxu0 %v3789_v8  ;;  %1746 = vmatpush1.bf16.msra.mxu1 %v3795_v9  ;;  %4522 = vst [vmem:[#allocation24_spill] sm:$0xff] %v4046_v25 }
 0x45c   :  { %1704 = vmatprep.subr.bf16.mxu0 %v3801_v11  ;;  %1747 = vmatprep.subr.bf16.mxu1 %v3807_v13 }
 0x45d   :  { %1734 = vmatprep.mubr.bf16.mxu0 %v4430_v61  ;;  %1777 = vmatprep.mubr.bf16.mxu1 %v4430_v61 }
 0x45f   :  { %1705 = vmatpush1.bf16.msra.mxu0 %v3815_v14  ;;  %1748 = vmatpush1.bf16.msra.mxu1 %v3821_v15 }
 0x460   :  { %1706 = vmatprep.subr.bf16.mxu0 %v3827_v16  ;;  %1749 = vmatprep.subr.bf16.mxu1 %v3833_v17 }
 0x463   :  { %1707 = vmatpush1.bf16.msra.mxu0 %v4503_v26  ;;  %1750 = vmatpush1.bf16.msra.mxu1 %v4504_v28 }
 0x464   :  { %1708 = vmatprep.subr.bf16.mxu0 %v4505_v29  ;;  %1751 = vmatprep.subr.bf16.mxu1 %v4506_v18 }
 0x467   :  { %1709 = vmatpush1.bf16.msra.mxu0 %v4507_v22  ;;  %1752 = vmatpush1.bf16.msra.mxu1 %v4508_v33 }
 0x468   :  { %1710 = vmatprep.subr.bf16.mxu0 %v4509_v59  ;;  %1753 = vmatprep.subr.bf16.mxu1 %v4510_v32 }
 0x46b   :  { %1711 = vmatpush1.bf16.msra.mxu0 %v4511_v36  ;;  %1754 = vmatpush1.bf16.msra.mxu1 %v4512_v19  ;;  %v4528_v19 = vld [vmem:[#allocation30_spill] sm:$0xff] }
 0x46c   :  { %1712 = vmatprep.subr.bf16.mxu0 %v4513_v24  ;;  %1755 = vmatprep.subr.bf16.mxu1 %v4514_v7 }
 0x46f   :  { %1713 = vmatpush1.bf16.msra.mxu0 %v4515_v20  ;;  %1756 = vmatpush1.bf16.msra.mxu1 %v4516_v27  ;;  %v4527_v27 = vld [vmem:[#allocation29_spill] sm:$0xff] }
 0x470   :  { %1714 = vmatprep.subr.bf16.mxu0 %v4016_v23  ;;  %1757 = vmatprep.subr.bf16.mxu1 %v4022_v10  ;;  %v4526_v10 = vld [vmem:[#allocation4_spill] sm:$0xff] }
 0x473   :  { %1715 = vmatpush1.bf16.msra.mxu0 %v4028_v30  ;;  %1758 = vmatpush1.bf16.msra.mxu1 %v4034_v51  ;;  %v4052_v30 = vld [vmem:[%s4286_s2 + $0xe0] ss:$16 sps:$4 sm:$0xff]   ;;  %v4058_v51 = vld [vmem:[%s4286_s2 + $0xe8] ss:$16 sps:$4 sm:$0xff]  }
 0x474   :  { %1716 = vmatprep.subr.bf16.mxu0 %v4040_v12  ;;  %1759 = vmatprep.subr.bf16.mxu1 %v4046_v25  ;;  %4523 = vst [vmem:[#allocation25_spill] sm:$0xff] %v4052_v30  ;;  %4524 = vst [vmem:[#allocation26_spill] sm:$0xff] %v4058_v51  ;;  %v4525_v12 = vld [vmem:[#allocation6_spill] sm:$0xff] }
 0x477   :  { %1717 = vmatpush1.bf16.msra.mxu0 %v4052_v30  ;;  %1760 = vmatpush1.bf16.msra.mxu1 %v4058_v51 }
 0x478   :  { %1848 = vmatprep.subr.bf16.mxu0 %v4525_v12  ;;  %1891 = vmatprep.subr.bf16.mxu1 %v4526_v10  ;;  %v4529_v10 = vld [vmem:[#allocation31_spill] sm:$0xff] }
 0x50d   :  { %v1501_v23 = vpop.f32.mrb[16].mxu0  ;;  %v1544_v25 = vpop.f32.mrb[16].mxu1 }
 0x50e   :  { %v2445_v20 = vadd.f32 %v1501_v23, %v4527_v27  ;;  %v1503_v7 = vpop.f32.mrb[17].mxu0  ;;  %v1546_v24 = vpop.f32.mrb[17].mxu1 }
 0x50f   :  { %v2446_v36 = vadd.f32 %v1503_v7, %v4528_v19  ;;  %v1505_v30 = vpop.f32.mrb[18].mxu0  ;;  %v1548_v32 = vpop.f32.mrb[18].mxu1  ;;  %v2450_v29 = vadd.f32 %v1546_v24, %v4529_v10  ;;  %v2449_v7 = vadd.f32 %v1544_v25, %v4461_v53 }
 0x510   :  { %v1561_v59 = vmul.f32 0.5, %v2445_v20  ;;  %v2447_v33 = vadd.f32 %v1505_v30, %v4527_v27  ;;  %v1507_v22 = vpop.f32.mrb[19].mxu0  ;;  %v1550_v18 = vpop.f32.mrb[19].mxu1  ;;  %v2451_v20 = vadd.f32 %v1548_v32, %v4461_v53 }
 0x511   :  { %v1562_v51 = vmul.f32 0.5, %v2446_v36  ;;  %v2448_v12 = vadd.f32 %v1507_v22, %v4528_v19  ;;  %v2452_v23 = vadd.f32 %v1550_v18, %v4529_v10  ;;  %v1563_v30 = vmul.f32 0.5, %v2449_v7 }
 0x512   :  { %2726 = vtanh.f32 %v1561_v59  ;;  %v1564_v28 = vmul.f32 0.5, %v2447_v33  ;;  %v1566_v59 = vmul.f32 0.5, %v2451_v20 }
 0x513   :  { %v1565_v26 = vmul.f32 0.5, %v2448_v12  ;;  %2728 = vtanh.f32 %v1562_v51 }
 0x514   :  { %2730 = vtanh.f32 %v1564_v28 }
 0x515   :  { %2732 = vtanh.f32 %v2450_v29 }
 0x516   :  { %2734 = vtanh.f32 %v1565_v26 }
 0x517   :  { %2736 = vtanh.f32 %v2452_v23 }
 0x518   :  { %2738 = vtanh.f32 %v1563_v30 }
 0x519   :  { %2740 = vtanh.f32 %v1566_v59 }
 0x51c   :  { %v2727_v36 = vpop.eup %2726 }
 0x51d   :  { %v1573_v27 = vmul.f32 0.5, %v2727_v36  ;;  %v2729_v22 = vpop.eup %2728 }
 0x51e   :  { %v2731_v19 = vpop.eup %2730  ;;  %v1574_v33 = vmul.f32 0.5, %v2729_v22 }
 0x51f   :  { %v1579_v24 = vadd.f32 0.5, %v1573_v27  ;;  %v2733_v51 = vpop.eup %2732  ;;  %v1576_v28 = vmul.f32 0.5, %v2731_v19 }
 0x520   :  { %v2735_v12 = vpop.eup %2734  ;;  %v1580_v18 = vadd.f32 0.5, %v1574_v33 }
 0x521   :  { %v1589_v29 = vmul.f32 %v2733_v51, %v1579_v24  ;;  %v1582_v10 = vadd.f32 0.5, %v1576_v28  ;;  %v1577_v26 = vmul.f32 0.5, %v2735_v12  ;;  %v2737_v25 = vpop.eup %2736  ;;  %v2644_v12 = vld [vmem:[%s4287_s0 + $0x30] sm:$0xff]  }
 0x522   :  { %v1587_v32 = vmul.f32 %v1580_v18, %v3939_v21  ;;  %v2739_v19 = vpop.eup %2738  ;;  %v4530_v18 = vld [vmem:[#allocation5_spill] sm:$0xff] }
 0x523   :  { %v1583_v23 = vadd.f32 0.5, %v1577_v26  ;;  %v1590_v7 = vmul.f32 %v2737_v25, %v1582_v10  ;;  %v2741_v30 = vpop.eup %2740  ;;  %v1575_v22 = vmul.f32 0.5, %v2739_v19  ;;  %v4532_v26 = vld [vmem:[#allocation7_spill] sm:$0xff]  ;;  %v4533_v25 = vld [vmem:[#allocation8_spill] sm:$0xff]  ;;  %v4538_v19 = vld [vmem:[#allocation13_spill] sm:$0xff] }
 0x524   :  { %v4072_v36 = vadd.f32 %v1589_v29, %v1587_v32  ;;  %v1578_v59 = vmul.f32 0.5, %v2741_v30  ;;  %v4531_v29 = vld [vmem:[#allocation32_spill] sm:$0xff]  ;;  %v4534_v32 = vld [vmem:[#allocation9_spill] sm:$0xff]  ;;  %v4539_v30 = vld [vmem:[#allocation14_spill] sm:$0xff] }
 0x525   :  { %v1588_v20 = vmul.f32 %v1583_v23, %v3943_v31  ;;  %v1581_v24 = vadd.f32 0.5, %v1575_v22  ;;  %v4535_v23 = vld [vmem:[#allocation10_spill] sm:$0xff]  ;;  %v4540_v22 = vld [vmem:[#allocation15_spill] sm:$0xff] }
 0x526   :  { %2742 = vtanh.f32 %v4072_v36  ;;  %v1584_v21 = vadd.f32 0.5, %v1578_v59  ;;  %v4541_v59 = vld [vmem:[#allocation16_spill] sm:$0xff] }
 0x527   :  { %v4076_v27 = vadd.f32 %v1590_v7, %v1588_v20  ;;  %v4536_v7 = vld [vmem:[#allocation11_spill] sm:$0xff]  ;;  %v4537_v20 = vld [vmem:[#allocation12_spill] sm:$0xff] }
 0x529   :  { %2744 = vtanh.f32 %v4076_v27 }
 0x530   :  { %v2743_v33 = vpop.eup %2742 }
 0x531   :  { %v1595_v51 = vmul.f32 %v2743_v33, %v1581_v24  ;;  %v4542_v24 = vld [vmem:[#allocation17_spill] sm:$0xff]  ;;  %v4543_v33 = vld [vmem:[#allocation18_spill] sm:$0xff] }
 0x533   :  { %v2745_v28 = vpop.eup %2744  ;;  %2396 = vst [vmem:[%s4289_s4 + $0x40] sm:$0xff] %v1595_v51 }
 0x534   :  { %v1596_v31 = vmul.f32 %v2745_v28, %v1584_v21  ;;  %v4545_v21 = vld [vmem:[#allocation20_spill] sm:$0xff]  ;;  %v4546_v28 = vld [vmem:[#allocation21_spill] sm:$0xff] }
 0x536   :  { %v1599_v10 = vpack.c.bf16 %v1596_v31, %v1595_v51  ;;  %2397 = vst [vmem:[%s4289_s4 + $0x48] sm:$0xff] %v1596_v31  ;;  %v4544_v51 = vld [vmem:[#allocation19_spill] sm:$0xff]  ;;  %v4547_v31 = vld [vmem:[#allocation22_spill] sm:$0xff] }
 0x538   :  { %1735 = vmatmul.mubr.bf16.vlgmr.msra.gmra.mrb[20].mxu0 %v1599_v10  ;;  %1778 = vmatmul.mubr.bf16.vlgmr.msra.gmra.mrb[20].mxu1 %v1599_v10  ;;  %v4548_v10 = vld [vmem:[#allocation23_spill] sm:$0xff] }
 0x539   :  { %1849 = vmatpush1.bf16.msra.mxu0 %v3592_v34  ;;  %1892 = vmatpush1.bf16.msra.mxu1 %v3598_v37 }
 0x53a   :  { %1850 = vmatprep.subr.bf16.mxu0 %v3604_v38  ;;  %1893 = vmatprep.subr.bf16.mxu1 %v3610_v39 }
 0x53b   :  { %1880 = vmatprep.mubr.bf16.mxu0 %v4430_v61  ;;  %1923 = vmatprep.mubr.bf16.mxu1 %v4430_v61 }
 0x53d   :  { %1851 = vmatpush1.bf16.msra.mxu0 %v3618_v40  ;;  %1894 = vmatpush1.bf16.msra.mxu1 %v3624_v41 }
 0x53e   :  { %1852 = vmatprep.subr.bf16.mxu0 %v3630_v42  ;;  %1895 = vmatprep.subr.bf16.mxu1 %v3636_v43 }
 0x541   :  { %1853 = vmatpush1.bf16.msra.mxu0 %v3642_v48  ;;  %1896 = vmatpush1.bf16.msra.mxu1 %v3648_v60 }
 0x542   :  { %1854 = vmatprep.subr.bf16.mxu0 %v3654_v0  ;;  %1897 = vmatprep.subr.bf16.mxu1 %v3660_v45 }
 0x545   :  { %1855 = vmatpush1.bf16.msra.mxu0 %v3666_v57  ;;  %1898 = vmatpush1.bf16.msra.mxu1 %v3672_v35 }
 0x546   :  { %1856 = vmatprep.subr.bf16.mxu0 %v3678_v44  ;;  %1899 = vmatprep.subr.bf16.mxu1 %v3684_v47 }
 0x549   :  { %1857 = vmatpush1.bf16.msra.mxu0 %v3690_v49  ;;  %1900 = vmatpush1.bf16.msra.mxu1 %v3696_v63 }
 0x54a   :  { %1858 = vmatprep.subr.bf16.mxu0 %v3702_v46  ;;  %1901 = vmatprep.subr.bf16.mxu1 %v3708_v58 }
 0x54d   :  { %1859 = vmatpush1.bf16.msra.mxu0 %v3714_v1  ;;  %1902 = vmatpush1.bf16.msra.mxu1 %v3720_v54 }
 0x54e   :  { %1860 = vmatprep.subr.bf16.mxu0 %v3726_v50  ;;  %1903 = vmatprep.subr.bf16.mxu1 %v3732_v56 }
 0x551   :  { %1861 = vmatpush1.bf16.msra.mxu0 %v3738_v62  ;;  %1904 = vmatpush1.bf16.msra.mxu1 %v3744_v55 }
 0x552   :  { %1862 = vmatprep.subr.bf16.mxu0 %v3750_v52  ;;  %1905 = vmatprep.subr.bf16.mxu1 %v3756_v2 }
 0x555   :  { %1863 = vmatpush1.bf16.msra.mxu0 %v3762_v3  ;;  %1906 = vmatpush1.bf16.msra.mxu1 %v3768_v4 }
 0x556   :  { %1937 = vmatprep.subr.bf16.mxu0 %v3774_v5  ;;  %1980 = vmatprep.subr.bf16.mxu1 %v3780_v6 }
 0x558   :  { %1881 = vmatmul.mubr.bf16.vlgmr.msra.gmra.mrb[24].mxu0 %v2644_v12  ;;  %1924 = vmatmul.mubr.bf16.vlgmr.msra.gmra.mrb[24].mxu1 %v2644_v12  ;;  %v4549_v12 = vld [vmem:[#allocation24_spill] sm:$0xff] }
 0x559   :  { %1938 = vmatpush1.bf16.msra.mxu0 %v3789_v8  ;;  %1981 = vmatpush1.bf16.msra.mxu1 %v3795_v9 }
 0x55a   :  { %1939 = vmatprep.subr.bf16.mxu0 %v3801_v11  ;;  %1982 = vmatprep.subr.bf16.mxu1 %v3807_v13 }
 0x55b   :  { %1969 = vmatprep.mubr.bf16.mxu0 %v4430_v61  ;;  %2012 = vmatprep.mubr.bf16.mxu1 %v4430_v61 }
 0x55d   :  { %1940 = vmatpush1.bf16.msra.mxu0 %v3815_v14  ;;  %1983 = vmatpush1.bf16.msra.mxu1 %v3821_v15 }
 0x55e   :  { %1941 = vmatprep.subr.bf16.mxu0 %v3827_v16  ;;  %1984 = vmatprep.subr.bf16.mxu1 %v3833_v17 }
 0x561   :  { %1942 = vmatpush1.bf16.msra.mxu0 %v4530_v18  ;;  %1985 = vmatpush1.bf16.msra.mxu1 %v4531_v29 }
 0x562   :  { %1943 = vmatprep.subr.bf16.mxu0 %v4532_v26  ;;  %1986 = vmatprep.subr.bf16.mxu1 %v4533_v25 }
 0x565   :  { %1944 = vmatpush1.bf16.msra.mxu0 %v4534_v32  ;;  %1987 = vmatpush1.bf16.msra.mxu1 %v4535_v23 }
 0x566   :  { %1945 = vmatprep.subr.bf16.mxu0 %v4536_v7  ;;  %1988 = vmatprep.subr.bf16.mxu1 %v4537_v20  ;;  %v4555_v7 = vld [vmem:[#allocation30_spill] sm:$0xff] }
 0x569   :  { %1946 = vmatpush1.bf16.msra.mxu0 %v4538_v19  ;;  %1989 = vmatpush1.bf16.msra.mxu1 %v4539_v30  ;;  %v4550_v30 = vld [vmem:[#allocation25_spill] sm:$0xff] }
 0x56a   :  { %1947 = vmatprep.subr.bf16.mxu0 %v4540_v22  ;;  %1990 = vmatprep.subr.bf16.mxu1 %v4541_v59  ;;  %v4551_v22 = vld [vmem:[#allocation26_spill] sm:$0xff]  ;;  %v4554_v19 = vld [vmem:[#allocation29_spill] sm:$0xff] }
 0x56b   :  { %v4552_v59 = vld [vmem:[#allocation6_spill] sm:$0xff] }
 0x56d   :  { %1948 = vmatpush1.bf16.msra.mxu0 %v4542_v24  ;;  %1991 = vmatpush1.bf16.msra.mxu1 %v4543_v33  ;;  %v4553_v24 = vld [vmem:[#allocation4_spill] sm:$0xff] }
 0x56e   :  { %1949 = vmatprep.subr.bf16.mxu0 %v4544_v51  ;;  %1992 = vmatprep.subr.bf16.mxu1 %v4545_v21 }
 0x571   :  { %1950 = vmatpush1.bf16.msra.mxu0 %v4546_v28  ;;  %1993 = vmatpush1.bf16.msra.mxu1 %v4547_v31 }
 0x572   :  { %1951 = vmatprep.subr.bf16.mxu0 %v4548_v10  ;;  %1994 = vmatprep.subr.bf16.mxu1 %v4549_v12 }
 0x575   :  { %1952 = vmatpush1.bf16.msra.mxu0 %v4550_v30  ;;  %1995 = vmatpush1.bf16.msra.mxu1 %v4551_v22 }
 0x576   :  { %2083 = vmatprep.subr.bf16.mxu0 %v4552_v59  ;;  %2126 = vmatprep.subr.bf16.mxu1 %v4553_v24  ;;  %v4556_v24 = vld [vmem:[#allocation31_spill] sm:$0xff] }
 0x60b   :  { %v1736_v33 = vpop.f32.mrb[20].mxu0  ;;  %v1779_v51 = vpop.f32.mrb[20].mxu1 }
 0x60c   :  { %v2453_v21 = vadd.f32 %v1736_v33, %v4554_v19  ;;  %v1738_v20 = vpop.f32.mrb[21].mxu0  ;;  %v1781_v28 = vpop.f32.mrb[21].mxu1 }
 0x60d   :  { %v2454_v31 = vadd.f32 %v1738_v20, %v4555_v7  ;;  %v1740_v23 = vpop.f32.mrb[22].mxu0  ;;  %v1783_v10 = vpop.f32.mrb[22].mxu1  ;;  %v2458_v26 = vadd.f32 %v1781_v28, %v4556_v24  ;;  %v2457_v20 = vadd.f32 %v1779_v51, %v4461_v53 }
 0x60e   :  { %v1796_v32 = vmul.f32 0.5, %v2453_v21  ;;  %v2455_v12 = vadd.f32 %v1740_v23, %v4554_v19  ;;  %v1742_v30 = vpop.f32.mrb[23].mxu0  ;;  %v1785_v25 = vpop.f32.mrb[23].mxu1  ;;  %v2459_v23 = vadd.f32 %v1783_v10, %v4461_v53 }
 0x60f   :  { %v1797_v22 = vmul.f32 0.5, %v2454_v31  ;;  %v2456_v59 = vadd.f32 %v1742_v30, %v4555_v7  ;;  %v2460_v33 = vadd.f32 %v1785_v25, %v4556_v24  ;;  %v1798_v21 = vmul.f32 0.5, %v2457_v20 }
 0x610   :  { %2746 = vtanh.f32 %v1796_v32  ;;  %v1799_v29 = vmul.f32 0.5, %v2455_v12  ;;  %v1801_v32 = vmul.f32 0.5, %v2459_v23 }
 0x611   :  { %v1800_v18 = vmul.f32 0.5, %v2456_v59  ;;  %2748 = vtanh.f32 %v1797_v22 }
 0x612   :  { %2750 = vtanh.f32 %v1799_v29 }
 0x613   :  { %2752 = vtanh.f32 %v2458_v26 }
 0x614   :  { %2754 = vtanh.f32 %v1800_v18 }
 0x615   :  { %2756 = vtanh.f32 %v2460_v33 }
 0x616   :  { %2758 = vtanh.f32 %v1798_v21 }
 0x617   :  { %2760 = vtanh.f32 %v1801_v32 }
 0x61a   :  { %v2747_v31 = vpop.eup %2746 }
 0x61b   :  { %v1808_v19 = vmul.f32 0.5, %v2747_v31  ;;  %v2749_v30 = vpop.eup %2748 }
 0x61c   :  { %v2751_v7 = vpop.eup %2750  ;;  %v1809_v12 = vmul.f32 0.5, %v2749_v30 }
 0x61d   :  { %v1814_v28 = vadd.f32 0.5, %v1808_v19  ;;  %v2753_v22 = vpop.eup %2752  ;;  %v1811_v29 = vmul.f32 0.5, %v2751_v7 }
 0x61e   :  { %v2755_v59 = vpop.eup %2754  ;;  %v1815_v25 = vadd.f32 0.5, %v1809_v12 }
 0x61f   :  { %v1824_v26 = vmul.f32 %v2753_v22, %v1814_v28  ;;  %v1817_v24 = vadd.f32 0.5, %v1811_v29  ;;  %v1812_v18 = vmul.f32 0.5, %v2755_v59  ;;  %v2757_v51 = vpop.eup %2756 }
 0x620   :  { %v1822_v10 = vmul.f32 %v1815_v25, %v4072_v36  ;;  %v2759_v7 = vpop.eup %2758 }
 0x621   :  { %v1818_v33 = vadd.f32 0.5, %v1812_v18  ;;  %v1825_v20 = vmul.f32 %v2757_v51, %v1817_v24  ;;  %v2761_v21 = vpop.eup %2760  ;;  %v1810_v30 = vmul.f32 0.5, %v2759_v7 }
 0x622   :  { %v4165_v31 = vadd.f32 %v1824_v26, %v1822_v10  ;;  %v1813_v32 = vmul.f32 0.5, %v2761_v21 }
 0x623   :  { %v1823_v23 = vmul.f32 %v1818_v33, %v4076_v27  ;;  %v1816_v28 = vadd.f32 0.5, %v1810_v30 }
 0x624   :  { %2762 = vtanh.f32 %v4165_v31  ;;  %v1819_v36 = vadd.f32 0.5, %v1813_v32 }
 0x625   :  { %v4169_v19 = vadd.f32 %v1825_v20, %v1823_v23 }
 0x627   :  { %2764 = vtanh.f32 %v4169_v19 }
 0x62e   :  { %v2763_v12 = vpop.eup %2762 }
 0x62f   :  { %v1830_v22 = vmul.f32 %v2763_v12, %v1816_v28 }
 0x631   :  { %v2765_v29 = vpop.eup %2764  ;;  %2401 = vst [vmem:[%s4289_s4 + $0x50] sm:$0xff] %v1830_v22 }
 0x632   :  { %v1831_v27 = vmul.f32 %v2765_v29, %v1819_v36 }
 0x634   :  { %v1834_v24 = vpack.c.bf16 %v1831_v27, %v1830_v22  ;;  %2402 = vst [vmem:[%s4289_s4 + $0x58] sm:$0xff] %v1831_v27 }
 0x636   :  { %1970 = vmatmul.mubr.bf16.vlgmr.msra.gmra.mrb[24].mxu0 %v1834_v24  ;;  %2013 = vmatmul.mubr.bf16.vlgmr.msra.gmra.mrb[24].mxu1 %v1834_v24 }
 0x637   :  { %2084 = vmatpush1.bf16.msra.mxu0 %v3592_v34  ;;  %2127 = vmatpush1.bf16.msra.mxu1 %v3598_v37  ;;  %v2645_v34 = vld [vmem:[%s4287_s0 + $0x38] sm:$0xff]   ;;  %v4557_v37 = vld [vmem:[#allocation5_spill] sm:$0xff] }
 0x638   :  { %2085 = vmatprep.subr.bf16.mxu0 %v3604_v38  ;;  %2128 = vmatprep.subr.bf16.mxu1 %v3610_v39  ;;  %v4558_v38 = vld [vmem:[#allocation32_spill] sm:$0xff]  ;;  %v4559_v39 = vld [vmem:[#allocation7_spill] sm:$0xff] }
 0x639   :  { %2115 = vmatprep.mubr.bf16.mxu0 %v4430_v61  ;;  %2158 = vmatprep.mubr.bf16.mxu1 %v4430_v61 }
 0x63b   :  { %2086 = vmatpush1.bf16.msra.mxu0 %v3618_v40  ;;  %2129 = vmatpush1.bf16.msra.mxu1 %v3624_v41  ;;  %v4560_v40 = vld [vmem:[#allocation8_spill] sm:$0xff]  ;;  %v4561_v41 = vld [vmem:[#allocation9_spill] sm:$0xff] }
 0x63c   :  { %2087 = vmatprep.subr.bf16.mxu0 %v3630_v42  ;;  %2130 = vmatprep.subr.bf16.mxu1 %v3636_v43  ;;  %v4562_v42 = vld [vmem:[#allocation10_spill] sm:$0xff]  ;;  %v4564_v43 = vld [vmem:[#allocation12_spill] sm:$0xff] }
 0x63f   :  { %2088 = vmatpush1.bf16.msra.mxu0 %v3642_v48  ;;  %2131 = vmatpush1.bf16.msra.mxu1 %v3648_v60  ;;  %v4565_v48 = vld [vmem:[#allocation13_spill] sm:$0xff]  ;;  %v4566_v60 = vld [vmem:[#allocation14_spill] sm:$0xff] }
 0x640   :  { %2089 = vmatprep.subr.bf16.mxu0 %v3654_v0  ;;  %2132 = vmatprep.subr.bf16.mxu1 %v3660_v45  ;;  %v4567_v0 = vld [vmem:[#allocation15_spill] sm:$0xff]  ;;  %v4568_v45 = vld [vmem:[#allocation16_spill] sm:$0xff] }
 0x643   :  { %2090 = vmatpush1.bf16.msra.mxu0 %v3666_v57  ;;  %2133 = vmatpush1.bf16.msra.mxu1 %v3672_v35  ;;  %v4569_v57 = vld [vmem:[#allocation17_spill] sm:$0xff]  ;;  %v4570_v35 = vld [vmem:[#allocation18_spill] sm:$0xff] }
 0x644   :  { %2091 = vmatprep.subr.bf16.mxu0 %v3678_v44  ;;  %2134 = vmatprep.subr.bf16.mxu1 %v3684_v47  ;;  %v4571_v44 = vld [vmem:[#allocation19_spill] sm:$0xff]  ;;  %v4572_v47 = vld [vmem:[#allocation20_spill] sm:$0xff] }
 0x647   :  { %2092 = vmatpush1.bf16.msra.mxu0 %v3690_v49  ;;  %2135 = vmatpush1.bf16.msra.mxu1 %v3696_v63  ;;  %v4573_v49 = vld [vmem:[#allocation21_spill] sm:$0xff]  ;;  %v4574_v63 = vld [vmem:[#allocation22_spill] sm:$0xff] }
 0x648   :  { %2093 = vmatprep.subr.bf16.mxu0 %v3702_v46  ;;  %2136 = vmatprep.subr.bf16.mxu1 %v3708_v58  ;;  %v4575_v46 = vld [vmem:[#allocation23_spill] sm:$0xff]  ;;  %v4576_v58 = vld [vmem:[#allocation24_spill] sm:$0xff] }
 0x64b   :  { %2094 = vmatpush1.bf16.msra.mxu0 %v3714_v1  ;;  %2137 = vmatpush1.bf16.msra.mxu1 %v3720_v54  ;;  %v4577_v1 = vld [vmem:[#allocation25_spill] sm:$0xff]  ;;  %v4578_v54 = vld [vmem:[#allocation26_spill] sm:$0xff] }
 0x64c   :  { %2095 = vmatprep.subr.bf16.mxu0 %v3726_v50  ;;  %2138 = vmatprep.subr.bf16.mxu1 %v3732_v56 }
 0x64f   :  { %2096 = vmatpush1.bf16.msra.mxu0 %v3738_v62  ;;  %2139 = vmatpush1.bf16.msra.mxu1 %v3744_v55  ;;  %v4579_v62 = vld [vmem:[#allocation29_spill] sm:$0xff] }
 0x650   :  { %2097 = vmatprep.subr.bf16.mxu0 %v3750_v52  ;;  %2140 = vmatprep.subr.bf16.mxu1 %v3756_v2 }
 0x653   :  { %2098 = vmatpush1.bf16.msra.mxu0 %v3762_v3  ;;  %2141 = vmatpush1.bf16.msra.mxu1 %v3768_v4  ;;  %v4580_v3 = vld [vmem:[#allocation30_spill] sm:$0xff] }
 0x654   :  { %2172 = vmatprep.subr.bf16.mxu0 %v3774_v5  ;;  %2215 = vmatprep.subr.bf16.mxu1 %v3780_v6 }
 0x656   :  { %2116 = vmatmul.mubr.bf16.vlgmr.msra.gmra.mrb[28].mxu0 %v2645_v34  ;;  %2159 = vmatmul.mubr.bf16.vlgmr.msra.gmra.mrb[28].mxu1 %v2645_v34 }
 0x657   :  { %2173 = vmatpush1.bf16.msra.mxu0 %v3789_v8  ;;  %2216 = vmatpush1.bf16.msra.mxu1 %v3795_v9 }
 0x658   :  { %2174 = vmatprep.subr.bf16.mxu0 %v3801_v11  ;;  %2217 = vmatprep.subr.bf16.mxu1 %v3807_v13 }
 0x659   :  { %2204 = vmatprep.mubr.bf16.mxu0 %v4430_v61  ;;  %2247 = vmatprep.mubr.bf16.mxu1 %v4430_v61  ;;  %v4563_v61 = vld [vmem:[#allocation11_spill] sm:$0xff] }
 0x65b   :  { %2175 = vmatpush1.bf16.msra.mxu0 %v3815_v14  ;;  %2218 = vmatpush1.bf16.msra.mxu1 %v3821_v15 }
 0x65c   :  { %2176 = vmatprep.subr.bf16.mxu0 %v3827_v16  ;;  %2219 = vmatprep.subr.bf16.mxu1 %v3833_v17  ;;  %v4581_v16 = vld [vmem:[#allocation31_spill] sm:$0xff] }
 0x65f   :  { %2177 = vmatpush1.bf16.msra.mxu0 %v4557_v37  ;;  %2220 = vmatpush1.bf16.msra.mxu1 %v4558_v38 }
 0x660   :  { %2178 = vmatprep.subr.bf16.mxu0 %v4559_v39  ;;  %2221 = vmatprep.subr.bf16.mxu1 %v4560_v40 }
 0x663   :  { %2179 = vmatpush1.bf16.msra.mxu0 %v4561_v41  ;;  %2222 = vmatpush1.bf16.msra.mxu1 %v4562_v42 }
 0x664   :  { %2180 = vmatprep.subr.bf16.mxu0 %v4563_v61  ;;  %2223 = vmatprep.subr.bf16.mxu1 %v4564_v43 }
 0x667   :  { %2181 = vmatpush1.bf16.msra.mxu0 %v4565_v48  ;;  %2224 = vmatpush1.bf16.msra.mxu1 %v4566_v60 }
 0x668   :  { %2182 = vmatprep.subr.bf16.mxu0 %v4567_v0  ;;  %2225 = vmatprep.subr.bf16.mxu1 %v4568_v45 }
 0x66b   :  { %2183 = vmatpush1.bf16.msra.mxu0 %v4569_v57  ;;  %2226 = vmatpush1.bf16.msra.mxu1 %v4570_v35 }
 0x66c   :  { %2184 = vmatprep.subr.bf16.mxu0 %v4571_v44  ;;  %2227 = vmatprep.subr.bf16.mxu1 %v4572_v47 }
 0x66f   :  { %2185 = vmatpush1.bf16.msra.mxu0 %v4573_v49  ;;  %2228 = vmatpush1.bf16.msra.mxu1 %v4574_v63 }
 0x670   :  { %2186 = vmatprep.subr.bf16.mxu0 %v4575_v46  ;;  %2229 = vmatprep.subr.bf16.mxu1 %v4576_v58 }
 0x673   :  { %2187 = vmatpush1.bf16.msra.mxu0 %v4577_v1  ;;  %2230 = vmatpush1.bf16.msra.mxu1 %v4578_v54 }
 0x709   :  { %v1971_v50 = vpop.f32.mrb[24].mxu0  ;;  %v2014_v56 = vpop.f32.mrb[24].mxu1 }
 0x70a   :  { %v2461_v55 = vadd.f32 %v1971_v50, %v4579_v62  ;;  %v1973_v52 = vpop.f32.mrb[25].mxu0  ;;  %v2016_v2 = vpop.f32.mrb[25].mxu1  ;;  %v2465_v18 = vadd.f32 %v2014_v56, %v4461_v53 }
 0x70b   :  { %v2462_v4 = vadd.f32 %v1973_v52, %v4580_v3  ;;  %v1975_v5 = vpop.f32.mrb[26].mxu0  ;;  %v2018_v6 = vpop.f32.mrb[26].mxu1  ;;  %v2466_v17 = vadd.f32 %v2016_v2, %v4581_v16 }
 0x70c   :  { %v2031_v8 = vmul.f32 0.5, %v2461_v55  ;;  %v2463_v9 = vadd.f32 %v1975_v5, %v4579_v62  ;;  %v1977_v11 = vpop.f32.mrb[27].mxu0  ;;  %v2020_v13 = vpop.f32.mrb[27].mxu1  ;;  %v2467_v51 = vadd.f32 %v2018_v6, %v4461_v53  ;;  %v2033_v10 = vmul.f32 0.5, %v2465_v18 }
 0x70d   :  { %v2032_v14 = vmul.f32 0.5, %v2462_v4  ;;  %v2464_v15 = vadd.f32 %v1977_v11, %v4580_v3  ;;  %v2468_v26 = vadd.f32 %v2020_v13, %v4581_v16 }
 0x70e   :  { %2766 = vtanh.f32 %v2031_v8  ;;  %v2034_v59 = vmul.f32 0.5, %v2463_v9  ;;  %v2036_v7 = vmul.f32 0.5, %v2467_v51 }
 0x70f   :  { %v2035_v25 = vmul.f32 0.5, %v2464_v15  ;;  %2768 = vtanh.f32 %v2032_v14 }
 0x710   :  { %2770 = vtanh.f32 %v2034_v59 }
 0x711   :  { %2772 = vtanh.f32 %v2466_v17 }
 0x712   :  { %2774 = vtanh.f32 %v2035_v25 }
 0x713   :  { %2776 = vtanh.f32 %v2468_v26 }
 0x714   :  { %2778 = vtanh.f32 %v2033_v10 }
 0x715   :  { %2780 = vtanh.f32 %v2036_v7 }
 0x718   :  { %v2767_v33 = vpop.eup %2766 }
 0x719   :  { %v2043_v20 = vmul.f32 0.5, %v2767_v33  ;;  %v2769_v23 = vpop.eup %2768 }
 0x71a   :  { %v2771_v21 = vpop.eup %2770  ;;  %v2044_v32 = vmul.f32 0.5, %v2769_v23 }
 0x71b   :  { %v2049_v30 = vadd.f32 0.5, %v2043_v20  ;;  %v2773_v28 = vpop.eup %2772  ;;  %v2046_v12 = vmul.f32 0.5, %v2771_v21 }
 0x71c   :  { %v2775_v22 = vpop.eup %2774  ;;  %v2050_v36 = vadd.f32 0.5, %v2044_v32 }
 0x71d   :  { %v2059_v29 = vmul.f32 %v2773_v28, %v2049_v30  ;;  %v2052_v27 = vadd.f32 0.5, %v2046_v12  ;;  %v2047_v24 = vmul.f32 0.5, %v2775_v22  ;;  %v2777_v34 = vpop.eup %2776 }
 0x71e   :  { %v2057_v37 = vmul.f32 %v2050_v36, %v4165_v31  ;;  %v2779_v61 = vpop.eup %2778 }
 0x71f   :  { %v2053_v38 = vadd.f32 0.5, %v2047_v24  ;;  %v2060_v39 = vmul.f32 %v2777_v34, %v2052_v27  ;;  %v2781_v43 = vpop.eup %2780  ;;  %v2045_v48 = vmul.f32 0.5, %v2779_v61 }
 0x720   :  { %v4256_v40 = vadd.f32 %v2059_v29, %v2057_v37  ;;  %v2048_v60 = vmul.f32 0.5, %v2781_v43 }
 0x721   :  { %v2058_v41 = vmul.f32 %v2053_v38, %v4169_v19  ;;  %v2051_v0 = vadd.f32 0.5, %v2045_v48 }
 0x722   :  { %2782 = vtanh.f32 %v4256_v40  ;;  %v2054_v31 = vadd.f32 0.5, %v2048_v60 }
 0x723   :  { %v4260_v42 = vadd.f32 %v2060_v39, %v2058_v41 }
 0x725   :  { %2784 = vtanh.f32 %v4260_v42 }
 0x72c   :  { %v2783_v45 = vpop.eup %2782 }
 0x72d   :  { %v2065_v57 = vmul.f32 %v2783_v45, %v2051_v0 }
 0x72f   :  { %v2785_v35 = vpop.eup %2784  ;;  %2406 = vst [vmem:[%s4289_s4 + $0x60] sm:$0xff] %v2065_v57 }
 0x730   :  { %v2066_v19 = vmul.f32 %v2785_v35, %v2054_v31 }
 0x732   :  { %v2069_v44 = vpack.c.bf16 %v2066_v19, %v2065_v57  ;;  %2407 = vst [vmem:[%s4289_s4 + $0x68] sm:$0xff] %v2066_v19 }
 0x734   :  { %2205 = vmatmul.mubr.bf16.vlgmr.msra.gmra.mrb[28].mxu0 %v2069_v44  ;;  %2248 = vmatmul.mubr.bf16.vlgmr.msra.gmra.mrb[28].mxu1 %v2069_v44 }
 0x807   :  { %v2206_v47 = vpop.f32.mrb[28].mxu0  ;;  %v2249_v49 = vpop.f32.mrb[28].mxu1 }
 0x808   :  { %v2469_v63 = vadd.f32 %v2206_v47, %v4579_v62  ;;  %v2208_v46 = vpop.f32.mrb[29].mxu0  ;;  %v2251_v58 = vpop.f32.mrb[29].mxu1  ;;  %v2473_v13 = vadd.f32 %v2249_v49, %v4461_v53 }
 0x809   :  { %v2470_v1 = vadd.f32 %v2208_v46, %v4580_v3  ;;  %v2210_v54 = vpop.f32.mrb[30].mxu0  ;;  %v2253_v50 = vpop.f32.mrb[30].mxu1  ;;  %v2474_v6 = vadd.f32 %v2251_v58, %v4581_v16 }
 0x80a   :  { %v2266_v56 = vmul.f32 0.5, %v2469_v63  ;;  %v2471_v55 = vadd.f32 %v2210_v54, %v4579_v62  ;;  %v2212_v52 = vpop.f32.mrb[31].mxu0  ;;  %v2255_v2 = vpop.f32.mrb[31].mxu1  ;;  %v2475_v62 = vadd.f32 %v2253_v50, %v4461_v53  ;;  %v2268_v14 = vmul.f32 0.5, %v2473_v13 }
 0x80b   :  { %v2267_v4 = vmul.f32 0.5, %v2470_v1  ;;  %v2472_v5 = vadd.f32 %v2212_v52, %v4580_v3  ;;  %v2476_v11 = vadd.f32 %v2255_v2, %v4581_v16 }
 0x80c   :  { %2786 = vtanh.f32 %v2266_v56  ;;  %v2269_v8 = vmul.f32 0.5, %v2471_v55  ;;  %v2271_v59 = vmul.f32 0.5, %v2475_v62 }
 0x80d   :  { %v2270_v9 = vmul.f32 0.5, %v2472_v5  ;;  %2788 = vtanh.f32 %v2267_v4 }
 0x80e   :  { %2790 = vtanh.f32 %v2269_v8 }
 0x80f   :  { %2792 = vtanh.f32 %v2474_v6 }
 0x810   :  { %2794 = vtanh.f32 %v2270_v9 }
 0x811   :  { %2796 = vtanh.f32 %v2476_v11 }
 0x812   :  { %2798 = vtanh.f32 %v2268_v14 }
 0x813   :  { %2800 = vtanh.f32 %v2271_v59 }
 0x816   :  { %v2787_v15 = vpop.eup %2786 }
 0x817   :  { %v2278_v17 = vmul.f32 0.5, %v2787_v15  ;;  %v2789_v3 = vpop.eup %2788 }
 0x818   :  { %v2791_v25 = vpop.eup %2790  ;;  %v2279_v18 = vmul.f32 0.5, %v2789_v3 }
 0x819   :  { %v2284_v26 = vadd.f32 0.5, %v2278_v17  ;;  %v2793_v51 = vpop.eup %2792  ;;  %v2281_v10 = vmul.f32 0.5, %v2791_v25 }
 0x81a   :  { %v2795_v33 = vpop.eup %2794  ;;  %v2285_v16 = vadd.f32 0.5, %v2279_v18 }
 0x81b   :  { %v2294_v20 = vmul.f32 %v2793_v51, %v2284_v26  ;;  %v2287_v23 = vadd.f32 0.5, %v2281_v10  ;;  %v2282_v7 = vmul.f32 0.5, %v2795_v33  ;;  %v2797_v21 = vpop.eup %2796 }
 0x81c   :  { %v2292_v53 = vmul.f32 %v2285_v16, %v4256_v40  ;;  %v2799_v36 = vpop.eup %2798 }
 0x81d   :  { %v2288_v30 = vadd.f32 0.5, %v2282_v7  ;;  %v2295_v32 = vmul.f32 %v2797_v21, %v2287_v23  ;;  %v2801_v29 = vpop.eup %2800  ;;  %v2280_v27 = vmul.f32 0.5, %v2799_v36 }
 0x81e   :  { %v2296_v28 = vadd.f32 %v2294_v20, %v2292_v53  ;;  %v2283_v24 = vmul.f32 0.5, %v2801_v29 }
 0x81f   :  { %v2293_v12 = vmul.f32 %v2288_v30, %v4260_v42  ;;  %v2286_v34 = vadd.f32 0.5, %v2280_v27 }
 0x820   :  { %2802 = vtanh.f32 %v2296_v28  ;;  %v2289_v39 = vadd.f32 0.5, %v2283_v24 }
 0x821   :  { %v2297_v22 = vadd.f32 %v2295_v32, %v2293_v12 }
 0x823   :  { %2804 = vtanh.f32 %v2297_v22 }
 0x82a   :  { %v2803_v37 = vpop.eup %2802 }
 0x82b   :  { %v2300_v38 = vmul.f32 %v2803_v37, %v2286_v34 }
 0x82d   :  { %v2805_v41 = vpop.eup %2804  ;;  %2411 = vst [vmem:[%s4289_s4 + $0x70] sm:$0xff] %v2300_v38 }
 0x82e   :  { %v2301_v40 = vmul.f32 %v2805_v41, %v2289_v39 }
 0x830   :  { %2412 = vst [vmem:[%s4289_s4 + $0x78] sm:$0xff] %v2301_v40 }

</bundles_post_ra>
